<compile_context>
chip_gen: v7x
topology: tpu7x:2x2x1
jax: 0.10.0
libtpu: 0.0.40
codegen_flags: <defaults>
</compile_context>

<pallas_src>
import functools

import jax
import jax.numpy as jnp
from jax.experimental import pallas as pl
from jax.experimental.pallas import tpu as pltpu


def _make_kernel(num_layers, hidden_size):
    H = hidden_size
    L = num_layers

    def kernel(*refs):
        x_ref = refs[0]                                   # (T, B, F) time-major
        w0x_ref, w0h_ref, b0_ref = refs[1:4]
        deep_refs = refs[4:4 + 3 * (L - 1)]               # (w_ihT, w_hhT, b) per layer
        wfc_ref, bfc_ref = refs[4 + 3 * (L - 1):6 + 3 * (L - 1)]
        out_ref = refs[6 + 3 * (L - 1)]

        xs = x_ref[...]                                   # (T, B, F) float32
        T, B, F = xs.shape
        mdt = w0h_ref.dtype                               # MXU operand dtype

        # ---- hoisted layer-0 input projection (time-major → contiguous rows)
        gx = jnp.dot(xs.reshape(T * B, F).astype(mdt), w0x_ref[...],
                     preferred_element_type=jnp.float32)
        gx = gx + b0_ref[...]                             # (T*B, 4H), f32

        # Hoisted weight/bias loads + broadcasts (kept out of the time loop).
        w0h = w0h_ref[...]                                # (H, 4H)
        deep = []
        for l in range(L - 1):
            w_ih = deep_refs[3 * l][...]                  # (H, 4H)
            w_hh = deep_refs[3 * l + 1][...]              # (H, 4H)
            b_full = jnp.broadcast_to(deep_refs[3 * l + 2][...], (B, 4 * H))
            deep.append((w_ih, w_hh, b_full))

        def cell(gates, c_prev):
            # Columns pre-permuted to [i, f, o, g]: one wide sigmoid + one tanh.
            sg = jax.nn.sigmoid(gates[:, 0:3 * H])        # (B, 3H) f32
            g_g = jnp.tanh(gates[:, 3 * H:4 * H])         # (B, H)  f32
            i_g = sg[:, 0:H]
            f_g = sg[:, H:2 * H]
            o_g = sg[:, 2 * H:3 * H]
            c_new = f_g * c_prev + i_g * g_g
            h_new = o_g * jnp.tanh(c_new)
            return h_new, c_new

        h = [jnp.zeros((B, H), jnp.float32) for _ in range(L)]   # h0 = 0
        c = [jnp.zeros((B, H), jnp.float32) for _ in range(L)]   # c0 = 0

        # Serial recurrence, fully unrolled (T is small); state lives in vregs.
        # For long sequences, replace with a chunked lax.fori_loop (4-8 step
        # inner unroll, h/c as carry) to bound vreg live ranges.
        for t in range(T):
            # layer 0: x-part precomputed; only the recurrent matmul remains.
            gates0 = gx[t * B:(t + 1) * B, :] + jnp.dot(
                h[0].astype(mdt), w0h, preferred_element_type=jnp.float32)
            h[0], c[0] = cell(gates0, c[0])
            inp = h[0]
            # deeper layers: two value-level matmuls, no VMEM staging.
            for li in range(1, L):
                w_ih, w_hh, b_full = deep[li - 1]
                gates = (jnp.dot(inp.astype(mdt), w_ih,
                                 preferred_element_type=jnp.float32)
                         + jnp.dot(h[li].astype(mdt), w_hh,
                                   preferred_element_type=jnp.float32)
                         + b_full)
                h[li], c[li] = cell(gates, c[li])
                inp = h[li]

        # fc1 head: VPU multiply + lane reduction (avoids an N=1 MXU push).
        out_ref[...] = (jnp.sum(inp * wfc_ref[...], axis=-1, keepdims=True)
                        + bfc_ref[...])

    return kernel


def _reorder_gate_cols(a, H):
    """Permute the last (4H) axis from torch [i,f,g,o] to [i,f,o,g]."""
    return jnp.concatenate(
        [a[..., 0:2 * H], a[..., 3 * H:4 * H], a[..., 2 * H:3 * H]], axis=-1)


def stock_model_forward(x, params, *, hidden_size, num_layers,
                        mxu_dtype=jnp.float32):
    """x: (B, T, F) float32, batch-first like the PyTorch module. Returns (B, 1).

    mxu_dtype=jnp.bfloat16 selects the bf16-MXU fast path (f32 accumulation
    and f32 gate math are kept either way); recurrent-state rounding compounds
    over T, so validate tolerance before defaulting to bf16 for long sequences.
    """
    B, T, F = x.shape
    H = hidden_size
    L = num_layers
    lstm = params["lstm"]

    x_tm = jnp.transpose(x, (1, 0, 2))                     # (T, B, F) one-off

    w_ih0, w_hh0, b_ih0, b_hh0 = lstm[0]
    flat = [
        x_tm,
        _reorder_gate_cols(jnp.transpose(w_ih0), H).astype(mxu_dtype),  # (F, 4H)
        _reorder_gate_cols(jnp.transpose(w_hh0), H).astype(mxu_dtype),  # (H, 4H)
        _reorder_gate_cols((b_ih0 + b_hh0).reshape(1, 4 * H), H),       # (1, 4H) f32
    ]
    for l in range(1, L):
        w_ih, w_hh, b_ih, b_hh = lstm[l]
        flat += [
            _reorder_gate_cols(jnp.transpose(w_ih), H).astype(mxu_dtype),   # (H, 4H)
            _reorder_gate_cols(jnp.transpose(w_hh), H).astype(mxu_dtype),   # (H, 4H)
            _reorder_gate_cols((b_ih + b_hh).reshape(1, 4 * H), H),         # (1, 4H)
        ]
    flat += [
        params["fc_w"].reshape(1, H),                      # (1, H) f32 (VPU head)
        params["fc_b"].reshape(1, 1),                      # (1, 1) f32
    ]

    kernel = _make_kernel(L, H)

    # No grid: all resident data is a few tens of KB, so every array is a
    # whole-array VMEM block and the serial time axis lives inside the kernel.
    return pl.pallas_call(
        kernel,
        out_shape=jax.ShapeDtypeStruct((B, 1), jnp.float32),
    )(*flat)


# ------------------------------------------------------------------ reference

def stock_model_reference(x, params, *, hidden_size, num_layers):
    B, T, _ = x.shape
    H = hidden_size
    h = [jnp.zeros((B, H), jnp.float32) for _ in range(num_layers)]
    c = [jnp.zeros((B, H), jnp.float32) for _ in range(num_layers)]
    for t in range(T):
        inp = x[:, t, :]
        for l in range(num_layers):
            w_ih, w_hh, b_ih, b_hh = params["lstm"][l]
            gates = inp @ w_ih.T + h[l] @ w_hh.T + b_ih + b_hh
            i_g = jax.nn.sigmoid(gates[:, 0:H])
            f_g = jax.nn.sigmoid(gates[:, H:2 * H])
            g_g = jnp.tanh(gates[:, 2 * H:3 * H])
            o_g = jax.nn.sigmoid(gates[:, 3 * H:4 * H])
            c[l] = f_g * c[l] + i_g * g_g
            h[l] = o_g * jnp.tanh(c[l])
            inp = h[l]
    return inp @ params["fc_w"].T + params["fc_b"]


# ------------------------------------------------------------------ params

def xavier_normal(key, shape):
    fan_out, fan_in = shape
    std = (2.0 / (fan_in + fan_out)) ** 0.5
    return std * jax.random.normal(key, shape, dtype=jnp.float32)


def init_params(key, input_size, hidden_size, num_layers):
    H = hidden_size
    layers = []
    for l in range(num_layers):
        in_l = input_size if l == 0 else H
        key, k1, k2 = jax.random.split(key, 3)
        w_ih = xavier_normal(k1, (4 * H, in_l))
        w_hh = xavier_normal(k2, (4 * H, H))
        b_ih = jnp.zeros((4 * H,), jnp.float32)
        b_hh = jnp.zeros((4 * H,), jnp.float32)
        layers.append((w_ih, w_hh, b_ih, b_hh))
    key, kf = jax.random.split(key)
    fc_w = xavier_normal(kf, (1, H))
    fc_b = jnp.zeros((1,), jnp.float32)
    return {"lstm": layers, "fc_w": fc_w, "fc_b": fc_b}


if __name__ == "__main__":
    # Shapes consistent with the module's forward:
    # x: (batch=4, seq=8, input_size=8), hidden_size=32, num_layers=2.
    B, T, F = 4, 8, 8
    H, L = 32, 2

    key = jax.random.PRNGKey(0)
    key, kx, kp = jax.random.split(key, 3)
    x = jax.random.normal(kx, (B, T, F), dtype=jnp.float32)
    params = init_params(kp, F, H, L)

    ref = stock_model_reference(x, params, hidden_size=H, num_layers=L)

    # f32 MXU path: exact parity target (1e-3).
    fwd_f32 = jax.jit(functools.partial(stock_model_forward,
                                        hidden_size=H, num_layers=L,
                                        mxu_dtype=jnp.float32))
    out = fwd_f32(x, params)
    jax.block_until_ready(out)
    assert out.shape == (B, 1), out.shape
    assert jnp.allclose(out, ref, rtol=1e-3, atol=1e-3), (out, ref)

    # bf16 MXU fast path (v6e/v7x recommendation): f32 accumulation + f32
    # gate math retained; looser tolerance because the recurrent state is
    # rounded to bf16 before each matmul.
    fwd_bf16 = jax.jit(functools.partial(stock_model_forward,
                                         hidden_size=H, num_layers=L,
                                         mxu_dtype=jnp.bfloat16))
    out_bf16 = fwd_bf16(x, params)
    jax.block_until_ready(out_bf16)
    assert out_bf16.shape == (B, 1), out_bf16.shape
    assert jnp.allclose(out_bf16, ref, rtol=5e-2, atol=5e-2), (out_bf16, ref)

    print("KERNEL_OK")
</pallas_src>

<mosaic_0001>
module attributes {stable_mosaic.version = 11 : i64} {
  func.func @kernel(%arg0: memref<8x4x8xf32, #tpu.memory_space<vmem>>, %arg1: memref<8x128xf32, #tpu.memory_space<vmem>>, %arg2: memref<32x128xf32, #tpu.memory_space<vmem>>, %arg3: memref<1x128xf32, #tpu.memory_space<vmem>>, %arg4: memref<32x128xf32, #tpu.memory_space<vmem>>, %arg5: memref<32x128xf32, #tpu.memory_space<vmem>>, %arg6: memref<1x128xf32, #tpu.memory_space<vmem>>, %arg7: memref<1x32xf32, #tpu.memory_space<vmem>>, %arg8: memref<1x1xf32, #tpu.memory_space<vmem>>, %arg9: memref<4x1xf32, #tpu.memory_space<vmem>>) attributes {dimension_semantics = [], scalar_prefetch = 0 : i64, scratch_operands = 0 : i64, tpu.core_type = #tpu.core_type<tc>} {
    %c0 = arith.constant 0 : index
    %c0_0 = arith.constant 0 : index
    %c0_1 = arith.constant 0 : index
    %0 = vector.load %arg0[%c0, %c0_0, %c0_1] : memref<8x4x8xf32, #tpu.memory_space<vmem>>, vector<8x4x8xf32>
    %1 = vector.shape_cast %0 : vector<8x4x8xf32> to vector<32x8xf32>
    %c0_2 = arith.constant 0 : index
    %c0_3 = arith.constant 0 : index
    %2 = vector.load %arg1[%c0_2, %c0_3] : memref<8x128xf32, #tpu.memory_space<vmem>>, vector<8x128xf32>
    %cst = arith.constant dense<0.000000e+00> : vector<32x128xf32>
    %3 = tpu.matmul %1, %2, %cst {dimension_numbers = #tpu.dot_dimension_numbers<[1], [0], [0], [1], [0, 0, 1, 1], [], []>} : vector<32x8xf32>, vector<8x128xf32>, vector<32x128xf32> -> vector<32x128xf32>
    %c0_4 = arith.constant 0 : index
    %c0_5 = arith.constant 0 : index
    %4 = vector.load %arg3[%c0_4, %c0_5] : memref<1x128xf32, #tpu.memory_space<vmem>>, vector<1x128xf32>
    %5 = vector.broadcast %4 : vector<1x128xf32> to vector<32x128xf32>
    %6 = arith.addf %3, %5 : vector<32x128xf32>
    %c0_6 = arith.constant 0 : index
    %c0_7 = arith.constant 0 : index
    %7 = vector.load %arg2[%c0_6, %c0_7] : memref<32x128xf32, #tpu.memory_space<vmem>>, vector<32x128xf32>
    %c0_8 = arith.constant 0 : index
    %c0_9 = arith.constant 0 : index
    %8 = vector.load %arg4[%c0_8, %c0_9] : memref<32x128xf32, #tpu.memory_space<vmem>>, vector<32x128xf32>
    %c0_10 = arith.constant 0 : index
    %c0_11 = arith.constant 0 : index
    %9 = vector.load %arg5[%c0_10, %c0_11] : memref<32x128xf32, #tpu.memory_space<vmem>>, vector<32x128xf32>
    %c0_12 = arith.constant 0 : index
    %c0_13 = arith.constant 0 : index
    %10 = vector.load %arg6[%c0_12, %c0_13] : memref<1x128xf32, #tpu.memory_space<vmem>>, vector<1x128xf32>
    %11 = vector.shape_cast %10 : vector<1x128xf32> to vector<1x128xf32>
    %12 = vector.broadcast %11 : vector<1x128xf32> to vector<4x128xf32>
    %cst_14 = arith.constant 0.000000e+00 : f32
    %13 = vector.broadcast %cst_14 : f32 to vector<4x32xf32>
    %cst_15 = arith.constant 0.000000e+00 : f32
    %14 = vector.broadcast %cst_15 : f32 to vector<4x32xf32>
    %cst_16 = arith.constant 0.000000e+00 : f32
    %15 = vector.broadcast %cst_16 : f32 to vector<4x32xf32>
    %cst_17 = arith.constant 0.000000e+00 : f32
    %16 = vector.broadcast %cst_17 : f32 to vector<4x32xf32>
    %17 = vector.extract_strided_slice %6 {offsets = [0, 0], sizes = [4, 128], strides = [1, 1]} : vector<32x128xf32> to vector<4x128xf32>
    %cst_18 = arith.constant dense<0.000000e+00> : vector<4x128xf32>
    %18 = tpu.matmul %13, %7, %cst_18 {dimension_numbers = #tpu.dot_dimension_numbers<[1], [0], [0], [1], [0, 0, 1, 1], [], []>} : vector<4x32xf32>, vector<32x128xf32>, vector<4x128xf32> -> vector<4x128xf32>
    %19 = arith.addf %17, %18 : vector<4x128xf32>
    %20 = vector.extract_strided_slice %19 {offsets = [0, 0], sizes = [4, 96], strides = [1, 1]} : vector<4x128xf32> to vector<4x96xf32>
    %21 = arith.negf %20 : vector<4x96xf32>
    %22 = math.exp %21 : vector<4x96xf32>
    %cst_19 = arith.constant 1.000000e+00 : f32
    %23 = vector.broadcast %cst_19 : f32 to vector<4x96xf32>
    %24 = arith.addf %23, %22 : vector<4x96xf32>
    %25 = arith.divf %23, %24 : vector<4x96xf32>
    %26 = vector.extract_strided_slice %19 {offsets = [0, 96], sizes = [4, 32], strides = [1, 1]} : vector<4x128xf32> to vector<4x32xf32>
    %27 = math.tanh %26 : vector<4x32xf32>
    %28 = vector.extract_strided_slice %25 {offsets = [0, 0], sizes = [4, 32], strides = [1, 1]} : vector<4x96xf32> to vector<4x32xf32>
    %29 = vector.extract_strided_slice %25 {offsets = [0, 32], sizes = [4, 32], strides = [1, 1]} : vector<4x96xf32> to vector<4x32xf32>
    %30 = vector.extract_strided_slice %25 {offsets = [0, 64], sizes = [4, 32], strides = [1, 1]} : vector<4x96xf32> to vector<4x32xf32>
    %31 = arith.mulf %29, %15 : vector<4x32xf32>
    %32 = arith.mulf %28, %27 : vector<4x32xf32>
    %33 = arith.addf %31, %32 : vector<4x32xf32>
    %34 = math.tanh %33 : vector<4x32xf32>
    %35 = arith.mulf %30, %34 : vector<4x32xf32>
    %cst_20 = arith.constant dense<0.000000e+00> : vector<4x128xf32>
    %36 = tpu.matmul %35, %8, %cst_20 {dimension_numbers = #tpu.dot_dimension_numbers<[1], [0], [0], [1], [0, 0, 1, 1], [], []>} : vector<4x32xf32>, vector<32x128xf32>, vector<4x128xf32> -> vector<4x128xf32>
    %cst_21 = arith.constant dense<0.000000e+00> : vector<4x128xf32>
    %37 = tpu.matmul %14, %9, %cst_21 {dimension_numbers = #tpu.dot_dimension_numbers<[1], [0], [0], [1], [0, 0, 1, 1], [], []>} : vector<4x32xf32>, vector<32x128xf32>, vector<4x128xf32> -> vector<4x128xf32>
    %38 = arith.addf %36, %37 : vector<4x128xf32>
    %39 = arith.addf %38, %12 : vector<4x128xf32>
    %40 = vector.extract_strided_slice %39 {offsets = [0, 0], sizes = [4, 96], strides = [1, 1]} : vector<4x128xf32> to vector<4x96xf32>
    %41 = arith.negf %40 : vector<4x96xf32>
    %42 = math.exp %41 : vector<4x96xf32>
    %cst_22 = arith.constant 1.000000e+00 : f32
    %43 = vector.broadcast %cst_22 : f32 to vector<4x96xf32>
    %44 = arith.addf %43, %42 : vector<4x96xf32>
    %45 = arith.divf %43, %44 : vector<4x96xf32>
    %46 = vector.extract_strided_slice %39 {offsets = [0, 96], sizes = [4, 32], strides = [1, 1]} : vector<4x128xf32> to vector<4x32xf32>
    %47 = math.tanh %46 : vector<4x32xf32>
    %48 = vector.extract_strided_slice %45 {offsets = [0, 0], sizes = [4, 32], strides = [1, 1]} : vector<4x96xf32> to vector<4x32xf32>
    %49 = vector.extract_strided_slice %45 {offsets = [0, 32], sizes = [4, 32], strides = [1, 1]} : vector<4x96xf32> to vector<4x32xf32>
    %50 = vector.extract_strided_slice %45 {offsets = [0, 64], sizes = [4, 32], strides = [1, 1]} : vector<4x96xf32> to vector<4x32xf32>
    %51 = arith.mulf %49, %16 : vector<4x32xf32>
    %52 = arith.mulf %48, %47 : vector<4x32xf32>
    %53 = arith.addf %51, %52 : vector<4x32xf32>
    %54 = math.tanh %53 : vector<4x32xf32>
    %55 = arith.mulf %50, %54 : vector<4x32xf32>
    %56 = vector.extract_strided_slice %6 {offsets = [4, 0], sizes = [4, 128], strides = [1, 1]} : vector<32x128xf32> to vector<4x128xf32>
    %cst_23 = arith.constant dense<0.000000e+00> : vector<4x128xf32>
    %57 = tpu.matmul %35, %7, %cst_23 {dimension_numbers = #tpu.dot_dimension_numbers<[1], [0], [0], [1], [0, 0, 1, 1], [], []>} : vector<4x32xf32>, vector<32x128xf32>, vector<4x128xf32> -> vector<4x128xf32>
    %58 = arith.addf %56, %57 : vector<4x128xf32>
    %59 = vector.extract_strided_slice %58 {offsets = [0, 0], sizes = [4, 96], strides = [1, 1]} : vector<4x128xf32> to vector<4x96xf32>
    %60 = arith.negf %59 : vector<4x96xf32>
    %61 = math.exp %60 : vector<4x96xf32>
    %cst_24 = arith.constant 1.000000e+00 : f32
    %62 = vector.broadcast %cst_24 : f32 to vector<4x96xf32>
    %63 = arith.addf %62, %61 : vector<4x96xf32>
    %64 = arith.divf %62, %63 : vector<4x96xf32>
    %65 = vector.extract_strided_slice %58 {offsets = [0, 96], sizes = [4, 32], strides = [1, 1]} : vector<4x128xf32> to vector<4x32xf32>
    %66 = math.tanh %65 : vector<4x32xf32>
    %67 = vector.extract_strided_slice %64 {offsets = [0, 0], sizes = [4, 32], strides = [1, 1]} : vector<4x96xf32> to vector<4x32xf32>
    %68 = vector.extract_strided_slice %64 {offsets = [0, 32], sizes = [4, 32], strides = [1, 1]} : vector<4x96xf32> to vector<4x32xf32>
    %69 = vector.extract_strided_slice %64 {offsets = [0, 64], sizes = [4, 32], strides = [1, 1]} : vector<4x96xf32> to vector<4x32xf32>
    %70 = arith.mulf %68, %33 : vector<4x32xf32>
    %71 = arith.mulf %67, %66 : vector<4x32xf32>
    %72 = arith.addf %70, %71 : vector<4x32xf32>
    %73 = math.tanh %72 : vector<4x32xf32>
    %74 = arith.mulf %69, %73 : vector<4x32xf32>
    %cst_25 = arith.constant dense<0.000000e+00> : vector<4x128xf32>
    %75 = tpu.matmul %74, %8, %cst_25 {dimension_numbers = #tpu.dot_dimension_numbers<[1], [0], [0], [1], [0, 0, 1, 1], [], []>} : vector<4x32xf32>, vector<32x128xf32>, vector<4x128xf32> -> vector<4x128xf32>
    %cst_26 = arith.constant dense<0.000000e+00> : vector<4x128xf32>
    %76 = tpu.matmul %55, %9, %cst_26 {dimension_numbers = #tpu.dot_dimension_numbers<[1], [0], [0], [1], [0, 0, 1, 1], [], []>} : vector<4x32xf32>, vector<32x128xf32>, vector<4x128xf32> -> vector<4x128xf32>
    %77 = arith.addf %75, %76 : vector<4x128xf32>
    %78 = arith.addf %77, %12 : vector<4x128xf32>
    %79 = vector.extract_strided_slice %78 {offsets = [0, 0], sizes = [4, 96], strides = [1, 1]} : vector<4x128xf32> to vector<4x96xf32>
    %80 = arith.negf %79 : vector<4x96xf32>
    %81 = math.exp %80 : vector<4x96xf32>
    %cst_27 = arith.constant 1.000000e+00 : f32
    %82 = vector.broadcast %cst_27 : f32 to vector<4x96xf32>
    %83 = arith.addf %82, %81 : vector<4x96xf32>
    %84 = arith.divf %82, %83 : vector<4x96xf32>
    %85 = vector.extract_strided_slice %78 {offsets = [0, 96], sizes = [4, 32], strides = [1, 1]} : vector<4x128xf32> to vector<4x32xf32>
    %86 = math.tanh %85 : vector<4x32xf32>
    %87 = vector.extract_strided_slice %84 {offsets = [0, 0], sizes = [4, 32], strides = [1, 1]} : vector<4x96xf32> to vector<4x32xf32>
    %88 = vector.extract_strided_slice %84 {offsets = [0, 32], sizes = [4, 32], strides = [1, 1]} : vector<4x96xf32> to vector<4x32xf32>
    %89 = vector.extract_strided_slice %84 {offsets = [0, 64], sizes = [4, 32], strides = [1, 1]} : vector<4x96xf32> to vector<4x32xf32>
    %90 = arith.mulf %88, %53 : vector<4x32xf32>
    %91 = arith.mulf %87, %86 : vector<4x32xf32>
    %92 = arith.addf %90, %91 : vector<4x32xf32>
    %93 = math.tanh %92 : vector<4x32xf32>
    %94 = arith.mulf %89, %93 : vector<4x32xf32>
    %95 = vector.extract_strided_slice %6 {offsets = [8, 0], sizes = [4, 128], strides = [1, 1]} : vector<32x128xf32> to vector<4x128xf32>
    %cst_28 = arith.constant dense<0.000000e+00> : vector<4x128xf32>
    %96 = tpu.matmul %74, %7, %cst_28 {dimension_numbers = #tpu.dot_dimension_numbers<[1], [0], [0], [1], [0, 0, 1, 1], [], []>} : vector<4x32xf32>, vector<32x128xf32>, vector<4x128xf32> -> vector<4x128xf32>
    %97 = arith.addf %95, %96 : vector<4x128xf32>
    %98 = vector.extract_strided_slice %97 {offsets = [0, 0], sizes = [4, 96], strides = [1, 1]} : vector<4x128xf32> to vector<4x96xf32>
    %99 = arith.negf %98 : vector<4x96xf32>
    %100 = math.exp %99 : vector<4x96xf32>
    %cst_29 = arith.constant 1.000000e+00 : f32
    %101 = vector.broadcast %cst_29 : f32 to vector<4x96xf32>
    %102 = arith.addf %101, %100 : vector<4x96xf32>
    %103 = arith.divf %101, %102 : vector<4x96xf32>
    %104 = vector.extract_strided_slice %97 {offsets = [0, 96], sizes = [4, 32], strides = [1, 1]} : vector<4x128xf32> to vector<4x32xf32>
    %105 = math.tanh %104 : vector<4x32xf32>
    %106 = vector.extract_strided_slice %103 {offsets = [0, 0], sizes = [4, 32], strides = [1, 1]} : vector<4x96xf32> to vector<4x32xf32>
    %107 = vector.extract_strided_slice %103 {offsets = [0, 32], sizes = [4, 32], strides = [1, 1]} : vector<4x96xf32> to vector<4x32xf32>
    %108 = vector.extract_strided_slice %103 {offsets = [0, 64], sizes = [4, 32], strides = [1, 1]} : vector<4x96xf32> to vector<4x32xf32>
    %109 = arith.mulf %107, %72 : vector<4x32xf32>
    %110 = arith.mulf %106, %105 : vector<4x32xf32>
    %111 = arith.addf %109, %110 : vector<4x32xf32>
    %112 = math.tanh %111 : vector<4x32xf32>
    %113 = arith.mulf %108, %112 : vector<4x32xf32>
    %cst_30 = arith.constant dense<0.000000e+00> : vector<4x128xf32>
    %114 = tpu.matmul %113, %8, %cst_30 {dimension_numbers = #tpu.dot_dimension_numbers<[1], [0], [0], [1], [0, 0, 1, 1], [], []>} : vector<4x32xf32>, vector<32x128xf32>, vector<4x128xf32> -> vector<4x128xf32>
    %cst_31 = arith.constant dense<0.000000e+00> : vector<4x128xf32>
    %115 = tpu.matmul %94, %9, %cst_31 {dimension_numbers = #tpu.dot_dimension_numbers<[1], [0], [0], [1], [0, 0, 1, 1], [], []>} : vector<4x32xf32>, vector<32x128xf32>, vector<4x128xf32> -> vector<4x128xf32>
    %116 = arith.addf %114, %115 : vector<4x128xf32>
    %117 = arith.addf %116, %12 : vector<4x128xf32>
    %118 = vector.extract_strided_slice %117 {offsets = [0, 0], sizes = [4, 96], strides = [1, 1]} : vector<4x128xf32> to vector<4x96xf32>
    %119 = arith.negf %118 : vector<4x96xf32>
    %120 = math.exp %119 : vector<4x96xf32>
    %cst_32 = arith.constant 1.000000e+00 : f32
    %121 = vector.broadcast %cst_32 : f32 to vector<4x96xf32>
    %122 = arith.addf %121, %120 : vector<4x96xf32>
    %123 = arith.divf %121, %122 : vector<4x96xf32>
    %124 = vector.extract_strided_slice %117 {offsets = [0, 96], sizes = [4, 32], strides = [1, 1]} : vector<4x128xf32> to vector<4x32xf32>
    %125 = math.tanh %124 : vector<4x32xf32>
    %126 = vector.extract_strided_slice %123 {offsets = [0, 0], sizes = [4, 32], strides = [1, 1]} : vector<4x96xf32> to vector<4x32xf32>
    %127 = vector.extract_strided_slice %123 {offsets = [0, 32], sizes = [4, 32], strides = [1, 1]} : vector<4x96xf32> to vector<4x32xf32>
    %128 = vector.extract_strided_slice %123 {offsets = [0, 64], sizes = [4, 32], strides = [1, 1]} : vector<4x96xf32> to vector<4x32xf32>
    %129 = arith.mulf %127, %92 : vector<4x32xf32>
    %130 = arith.mulf %126, %125 : vector<4x32xf32>
    %131 = arith.addf %129, %130 : vector<4x32xf32>
    %132 = math.tanh %131 : vector<4x32xf32>
    %133 = arith.mulf %128, %132 : vector<4x32xf32>
    %134 = vector.extract_strided_slice %6 {offsets = [12, 0], sizes = [4, 128], strides = [1, 1]} : vector<32x128xf32> to vector<4x128xf32>
    %cst_33 = arith.constant dense<0.000000e+00> : vector<4x128xf32>
    %135 = tpu.matmul %113, %7, %cst_33 {dimension_numbers = #tpu.dot_dimension_numbers<[1], [0], [0], [1], [0, 0, 1, 1], [], []>} : vector<4x32xf32>, vector<32x128xf32>, vector<4x128xf32> -> vector<4x128xf32>
    %136 = arith.addf %134, %135 : vector<4x128xf32>
    %137 = vector.extract_strided_slice %136 {offsets = [0, 0], sizes = [4, 96], strides = [1, 1]} : vector<4x128xf32> to vector<4x96xf32>
    %138 = arith.negf %137 : vector<4x96xf32>
    %139 = math.exp %138 : vector<4x96xf32>
    %cst_34 = arith.constant 1.000000e+00 : f32
    %140 = vector.broadcast %cst_34 : f32 to vector<4x96xf32>
    %141 = arith.addf %140, %139 : vector<4x96xf32>
    %142 = arith.divf %140, %141 : vector<4x96xf32>
    %143 = vector.extract_strided_slice %136 {offsets = [0, 96], sizes = [4, 32], strides = [1, 1]} : vector<4x128xf32> to vector<4x32xf32>
    %144 = math.tanh %143 : vector<4x32xf32>
    %145 = vector.extract_strided_slice %142 {offsets = [0, 0], sizes = [4, 32], strides = [1, 1]} : vector<4x96xf32> to vector<4x32xf32>
    %146 = vector.extract_strided_slice %142 {offsets = [0, 32], sizes = [4, 32], strides = [1, 1]} : vector<4x96xf32> to vector<4x32xf32>
    %147 = vector.extract_strided_slice %142 {offsets = [0, 64], sizes = [4, 32], strides = [1, 1]} : vector<4x96xf32> to vector<4x32xf32>
    %148 = arith.mulf %146, %111 : vector<4x32xf32>
    %149 = arith.mulf %145, %144 : vector<4x32xf32>
    %150 = arith.addf %148, %149 : vector<4x32xf32>
    %151 = math.tanh %150 : vector<4x32xf32>
    %152 = arith.mulf %147, %151 : vector<4x32xf32>
    %cst_35 = arith.constant dense<0.000000e+00> : vector<4x128xf32>
    %153 = tpu.matmul %152, %8, %cst_35 {dimension_numbers = #tpu.dot_dimension_numbers<[1], [0], [0], [1], [0, 0, 1, 1], [], []>} : vector<4x32xf32>, vector<32x128xf32>, vector<4x128xf32> -> vector<4x128xf32>
    %cst_36 = arith.constant dense<0.000000e+00> : vector<4x128xf32>
    %154 = tpu.matmul %133, %9, %cst_36 {dimension_numbers = #tpu.dot_dimension_numbers<[1], [0], [0], [1], [0, 0, 1, 1], [], []>} : vector<4x32xf32>, vector<32x128xf32>, vector<4x128xf32> -> vector<4x128xf32>
    %155 = arith.addf %153, %154 : vector<4x128xf32>
    %156 = arith.addf %155, %12 : vector<4x128xf32>
    %157 = vector.extract_strided_slice %156 {offsets = [0, 0], sizes = [4, 96], strides = [1, 1]} : vector<4x128xf32> to vector<4x96xf32>
    %158 = arith.negf %157 : vector<4x96xf32>
    %159 = math.exp %158 : vector<4x96xf32>
    %cst_37 = arith.constant 1.000000e+00 : f32
    %160 = vector.broadcast %cst_37 : f32 to vector<4x96xf32>
    %161 = arith.addf %160, %159 : vector<4x96xf32>
    %162 = arith.divf %160, %161 : vector<4x96xf32>
    %163 = vector.extract_strided_slice %156 {offsets = [0, 96], sizes = [4, 32], strides = [1, 1]} : vector<4x128xf32> to vector<4x32xf32>
    %164 = math.tanh %163 : vector<4x32xf32>
    %165 = vector.extract_strided_slice %162 {offsets = [0, 0], sizes = [4, 32], strides = [1, 1]} : vector<4x96xf32> to vector<4x32xf32>
    %166 = vector.extract_strided_slice %162 {offsets = [0, 32], sizes = [4, 32], strides = [1, 1]} : vector<4x96xf32> to vector<4x32xf32>
    %167 = vector.extract_strided_slice %162 {offsets = [0, 64], sizes = [4, 32], strides = [1, 1]} : vector<4x96xf32> to vector<4x32xf32>
    %168 = arith.mulf %166, %131 : vector<4x32xf32>
    %169 = arith.mulf %165, %164 : vector<4x32xf32>
    %170 = arith.addf %168, %169 : vector<4x32xf32>
    %171 = math.tanh %170 : vector<4x32xf32>
    %172 = arith.mulf %167, %171 : vector<4x32xf32>
    %173 = vector.extract_strided_slice %6 {offsets = [16, 0], sizes = [4, 128], strides = [1, 1]} : vector<32x128xf32> to vector<4x128xf32>
    %cst_38 = arith.constant dense<0.000000e+00> : vector<4x128xf32>
    %174 = tpu.matmul %152, %7, %cst_38 {dimension_numbers = #tpu.dot_dimension_numbers<[1], [0], [0], [1], [0, 0, 1, 1], [], []>} : vector<4x32xf32>, vector<32x128xf32>, vector<4x128xf32> -> vector<4x128xf32>
    %175 = arith.addf %173, %174 : vector<4x128xf32>
    %176 = vector.extract_strided_slice %175 {offsets = [0, 0], sizes = [4, 96], strides = [1, 1]} : vector<4x128xf32> to vector<4x96xf32>
    %177 = arith.negf %176 : vector<4x96xf32>
    %178 = math.exp %177 : vector<4x96xf32>
    %cst_39 = arith.constant 1.000000e+00 : f32
    %179 = vector.broadcast %cst_39 : f32 to vector<4x96xf32>
    %180 = arith.addf %179, %178 : vector<4x96xf32>
    %181 = arith.divf %179, %180 : vector<4x96xf32>
    %182 = vector.extract_strided_slice %175 {offsets = [0, 96], sizes = [4, 32], strides = [1, 1]} : vector<4x128xf32> to vector<4x32xf32>
    %183 = math.tanh %182 : vector<4x32xf32>
    %184 = vector.extract_strided_slice %181 {offsets = [0, 0], sizes = [4, 32], strides = [1, 1]} : vector<4x96xf32> to vector<4x32xf32>
    %185 = vector.extract_strided_slice %181 {offsets = [0, 32], sizes = [4, 32], strides = [1, 1]} : vector<4x96xf32> to vector<4x32xf32>
    %186 = vector.extract_strided_slice %181 {offsets = [0, 64], sizes = [4, 32], strides = [1, 1]} : vector<4x96xf32> to vector<4x32xf32>
    %187 = arith.mulf %185, %150 : vector<4x32xf32>
    %188 = arith.mulf %184, %183 : vector<4x32xf32>
    %189 = arith.addf %187, %188 : vector<4x32xf32>
    %190 = math.tanh %189 : vector<4x32xf32>
    %191 = arith.mulf %186, %190 : vector<4x32xf32>
    %cst_40 = arith.constant dense<0.000000e+00> : vector<4x128xf32>
    %192 = tpu.matmul %191, %8, %cst_40 {dimension_numbers = #tpu.dot_dimension_numbers<[1], [0], [0], [1], [0, 0, 1, 1], [], []>} : vector<4x32xf32>, vector<32x128xf32>, vector<4x128xf32> -> vector<4x128xf32>
    %cst_41 = arith.constant dense<0.000000e+00> : vector<4x128xf32>
    %193 = tpu.matmul %172, %9, %cst_41 {dimension_numbers = #tpu.dot_dimension_numbers<[1], [0], [0], [1], [0, 0, 1, 1], [], []>} : vector<4x32xf32>, vector<32x128xf32>, vector<4x128xf32> -> vector<4x128xf32>
    %194 = arith.addf %192, %193 : vector<4x128xf32>
    %195 = arith.addf %194, %12 : vector<4x128xf32>
    %196 = vector.extract_strided_slice %195 {offsets = [0, 0], sizes = [4, 96], strides = [1, 1]} : vector<4x128xf32> to vector<4x96xf32>
    %197 = arith.negf %196 : vector<4x96xf32>
    %198 = math.exp %197 : vector<4x96xf32>
    %cst_42 = arith.constant 1.000000e+00 : f32
    %199 = vector.broadcast %cst_42 : f32 to vector<4x96xf32>
    %200 = arith.addf %199, %198 : vector<4x96xf32>
    %201 = arith.divf %199, %200 : vector<4x96xf32>
    %202 = vector.extract_strided_slice %195 {offsets = [0, 96], sizes = [4, 32], strides = [1, 1]} : vector<4x128xf32> to vector<4x32xf32>
    %203 = math.tanh %202 : vector<4x32xf32>
    %204 = vector.extract_strided_slice %201 {offsets = [0, 0], sizes = [4, 32], strides = [1, 1]} : vector<4x96xf32> to vector<4x32xf32>
    %205 = vector.extract_strided_slice %201 {offsets = [0, 32], sizes = [4, 32], strides = [1, 1]} : vector<4x96xf32> to vector<4x32xf32>
    %206 = vector.extract_strided_slice %201 {offsets = [0, 64], sizes = [4, 32], strides = [1, 1]} : vector<4x96xf32> to vector<4x32xf32>
    %207 = arith.mulf %205, %170 : vector<4x32xf32>
    %208 = arith.mulf %204, %203 : vector<4x32xf32>
    %209 = arith.addf %207, %208 : vector<4x32xf32>
    %210 = math.tanh %209 : vector<4x32xf32>
    %211 = arith.mulf %206, %210 : vector<4x32xf32>
    %212 = vector.extract_strided_slice %6 {offsets = [20, 0], sizes = [4, 128], strides = [1, 1]} : vector<32x128xf32> to vector<4x128xf32>
    %cst_43 = arith.constant dense<0.000000e+00> : vector<4x128xf32>
    %213 = tpu.matmul %191, %7, %cst_43 {dimension_numbers = #tpu.dot_dimension_numbers<[1], [0], [0], [1], [0, 0, 1, 1], [], []>} : vector<4x32xf32>, vector<32x128xf32>, vector<4x128xf32> -> vector<4x128xf32>
    %214 = arith.addf %212, %213 : vector<4x128xf32>
    %215 = vector.extract_strided_slice %214 {offsets = [0, 0], sizes = [4, 96], strides = [1, 1]} : vector<4x128xf32> to vector<4x96xf32>
    %216 = arith.negf %215 : vector<4x96xf32>
    %217 = math.exp %216 : vector<4x96xf32>
    %cst_44 = arith.constant 1.000000e+00 : f32
    %218 = vector.broadcast %cst_44 : f32 to vector<4x96xf32>
    %219 = arith.addf %218, %217 : vector<4x96xf32>
    %220 = arith.divf %218, %219 : vector<4x96xf32>
    %221 = vector.extract_strided_slice %214 {offsets = [0, 96], sizes = [4, 32], strides = [1, 1]} : vector<4x128xf32> to vector<4x32xf32>
    %222 = math.tanh %221 : vector<4x32xf32>
    %223 = vector.extract_strided_slice %220 {offsets = [0, 0], sizes = [4, 32], strides = [1, 1]} : vector<4x96xf32> to vector<4x32xf32>
    %224 = vector.extract_strided_slice %220 {offsets = [0, 32], sizes = [4, 32], strides = [1, 1]} : vector<4x96xf32> to vector<4x32xf32>
    %225 = vector.extract_strided_slice %220 {offsets = [0, 64], sizes = [4, 32], strides = [1, 1]} : vector<4x96xf32> to vector<4x32xf32>
    %226 = arith.mulf %224, %189 : vector<4x32xf32>
    %227 = arith.mulf %223, %222 : vector<4x32xf32>
    %228 = arith.addf %226, %227 : vector<4x32xf32>
    %229 = math.tanh %228 : vector<4x32xf32>
    %230 = arith.mulf %225, %229 : vector<4x32xf32>
    %cst_45 = arith.constant dense<0.000000e+00> : vector<4x128xf32>
    %231 = tpu.matmul %230, %8, %cst_45 {dimension_numbers = #tpu.dot_dimension_numbers<[1], [0], [0], [1], [0, 0, 1, 1], [], []>} : vector<4x32xf32>, vector<32x128xf32>, vector<4x128xf32> -> vector<4x128xf32>
    %cst_46 = arith.constant dense<0.000000e+00> : vector<4x128xf32>
    %232 = tpu.matmul %211, %9, %cst_46 {dimension_numbers = #tpu.dot_dimension_numbers<[1], [0], [0], [1], [0, 0, 1, 1], [], []>} : vector<4x32xf32>, vector<32x128xf32>, vector<4x128xf32> -> vector<4x128xf32>
    %233 = arith.addf %231, %232 : vector<4x128xf32>
    %234 = arith.addf %233, %12 : vector<4x128xf32>
    %235 = vector.extract_strided_slice %234 {offsets = [0, 0], sizes = [4, 96], strides = [1, 1]} : vector<4x128xf32> to vector<4x96xf32>
    %236 = arith.negf %235 : vector<4x96xf32>
    %237 = math.exp %236 : vector<4x96xf32>
    %cst_47 = arith.constant 1.000000e+00 : f32
    %238 = vector.broadcast %cst_47 : f32 to vector<4x96xf32>
    %239 = arith.addf %238, %237 : vector<4x96xf32>
    %240 = arith.divf %238, %239 : vector<4x96xf32>
    %241 = vector.extract_strided_slice %234 {offsets = [0, 96], sizes = [4, 32], strides = [1, 1]} : vector<4x128xf32> to vector<4x32xf32>
    %242 = math.tanh %241 : vector<4x32xf32>
    %243 = vector.extract_strided_slice %240 {offsets = [0, 0], sizes = [4, 32], strides = [1, 1]} : vector<4x96xf32> to vector<4x32xf32>
    %244 = vector.extract_strided_slice %240 {offsets = [0, 32], sizes = [4, 32], strides = [1, 1]} : vector<4x96xf32> to vector<4x32xf32>
    %245 = vector.extract_strided_slice %240 {offsets = [0, 64], sizes = [4, 32], strides = [1, 1]} : vector<4x96xf32> to vector<4x32xf32>
    %246 = arith.mulf %244, %209 : vector<4x32xf32>
    %247 = arith.mulf %243, %242 : vector<4x32xf32>
    %248 = arith.addf %246, %247 : vector<4x32xf32>
    %249 = math.tanh %248 : vector<4x32xf32>
    %250 = arith.mulf %245, %249 : vector<4x32xf32>
    %251 = vector.extract_strided_slice %6 {offsets = [24, 0], sizes = [4, 128], strides = [1, 1]} : vector<32x128xf32> to vector<4x128xf32>
    %cst_48 = arith.constant dense<0.000000e+00> : vector<4x128xf32>
    %252 = tpu.matmul %230, %7, %cst_48 {dimension_numbers = #tpu.dot_dimension_numbers<[1], [0], [0], [1], [0, 0, 1, 1], [], []>} : vector<4x32xf32>, vector<32x128xf32>, vector<4x128xf32> -> vector<4x128xf32>
    %253 = arith.addf %251, %252 : vector<4x128xf32>
    %254 = vector.extract_strided_slice %253 {offsets = [0, 0], sizes = [4, 96], strides = [1, 1]} : vector<4x128xf32> to vector<4x96xf32>
    %255 = arith.negf %254 : vector<4x96xf32>
    %256 = math.exp %255 : vector<4x96xf32>
    %cst_49 = arith.constant 1.000000e+00 : f32
    %257 = vector.broadcast %cst_49 : f32 to vector<4x96xf32>
    %258 = arith.addf %257, %256 : vector<4x96xf32>
    %259 = arith.divf %257, %258 : vector<4x96xf32>
    %260 = vector.extract_strided_slice %253 {offsets = [0, 96], sizes = [4, 32], strides = [1, 1]} : vector<4x128xf32> to vector<4x32xf32>
    %261 = math.tanh %260 : vector<4x32xf32>
    %262 = vector.extract_strided_slice %259 {offsets = [0, 0], sizes = [4, 32], strides = [1, 1]} : vector<4x96xf32> to vector<4x32xf32>
    %263 = vector.extract_strided_slice %259 {offsets = [0, 32], sizes = [4, 32], strides = [1, 1]} : vector<4x96xf32> to vector<4x32xf32>
    %264 = vector.extract_strided_slice %259 {offsets = [0, 64], sizes = [4, 32], strides = [1, 1]} : vector<4x96xf32> to vector<4x32xf32>
    %265 = arith.mulf %263, %228 : vector<4x32xf32>
    %266 = arith.mulf %262, %261 : vector<4x32xf32>
    %267 = arith.addf %265, %266 : vector<4x32xf32>
    %268 = math.tanh %267 : vector<4x32xf32>
    %269 = arith.mulf %264, %268 : vector<4x32xf32>
    %cst_50 = arith.constant dense<0.000000e+00> : vector<4x128xf32>
    %270 = tpu.matmul %269, %8, %cst_50 {dimension_numbers = #tpu.dot_dimension_numbers<[1], [0], [0], [1], [0, 0, 1, 1], [], []>} : vector<4x32xf32>, vector<32x128xf32>, vector<4x128xf32> -> vector<4x128xf32>
    %cst_51 = arith.constant dense<0.000000e+00> : vector<4x128xf32>
    %271 = tpu.matmul %250, %9, %cst_51 {dimension_numbers = #tpu.dot_dimension_numbers<[1], [0], [0], [1], [0, 0, 1, 1], [], []>} : vector<4x32xf32>, vector<32x128xf32>, vector<4x128xf32> -> vector<4x128xf32>
    %272 = arith.addf %270, %271 : vector<4x128xf32>
    %273 = arith.addf %272, %12 : vector<4x128xf32>
    %274 = vector.extract_strided_slice %273 {offsets = [0, 0], sizes = [4, 96], strides = [1, 1]} : vector<4x128xf32> to vector<4x96xf32>
    %275 = arith.negf %274 : vector<4x96xf32>
    %276 = math.exp %275 : vector<4x96xf32>
    %cst_52 = arith.constant 1.000000e+00 : f32
    %277 = vector.broadcast %cst_52 : f32 to vector<4x96xf32>
    %278 = arith.addf %277, %276 : vector<4x96xf32>
    %279 = arith.divf %277, %278 : vector<4x96xf32>
    %280 = vector.extract_strided_slice %273 {offsets = [0, 96], sizes = [4, 32], strides = [1, 1]} : vector<4x128xf32> to vector<4x32xf32>
    %281 = math.tanh %280 : vector<4x32xf32>
    %282 = vector.extract_strided_slice %279 {offsets = [0, 0], sizes = [4, 32], strides = [1, 1]} : vector<4x96xf32> to vector<4x32xf32>
    %283 = vector.extract_strided_slice %279 {offsets = [0, 32], sizes = [4, 32], strides = [1, 1]} : vector<4x96xf32> to vector<4x32xf32>
    %284 = vector.extract_strided_slice %279 {offsets = [0, 64], sizes = [4, 32], strides = [1, 1]} : vector<4x96xf32> to vector<4x32xf32>
    %285 = arith.mulf %283, %248 : vector<4x32xf32>
    %286 = arith.mulf %282, %281 : vector<4x32xf32>
    %287 = arith.addf %285, %286 : vector<4x32xf32>
    %288 = math.tanh %287 : vector<4x32xf32>
    %289 = arith.mulf %284, %288 : vector<4x32xf32>
    %290 = vector.extract_strided_slice %6 {offsets = [28, 0], sizes = [4, 128], strides = [1, 1]} : vector<32x128xf32> to vector<4x128xf32>
    %cst_53 = arith.constant dense<0.000000e+00> : vector<4x128xf32>
    %291 = tpu.matmul %269, %7, %cst_53 {dimension_numbers = #tpu.dot_dimension_numbers<[1], [0], [0], [1], [0, 0, 1, 1], [], []>} : vector<4x32xf32>, vector<32x128xf32>, vector<4x128xf32> -> vector<4x128xf32>
    %292 = arith.addf %290, %291 : vector<4x128xf32>
    %293 = vector.extract_strided_slice %292 {offsets = [0, 0], sizes = [4, 96], strides = [1, 1]} : vector<4x128xf32> to vector<4x96xf32>
    %294 = arith.negf %293 : vector<4x96xf32>
    %295 = math.exp %294 : vector<4x96xf32>
    %cst_54 = arith.constant 1.000000e+00 : f32
    %296 = vector.broadcast %cst_54 : f32 to vector<4x96xf32>
    %297 = arith.addf %296, %295 : vector<4x96xf32>
    %298 = arith.divf %296, %297 : vector<4x96xf32>
    %299 = vector.extract_strided_slice %292 {offsets = [0, 96], sizes = [4, 32], strides = [1, 1]} : vector<4x128xf32> to vector<4x32xf32>
    %300 = math.tanh %299 : vector<4x32xf32>
    %301 = vector.extract_strided_slice %298 {offsets = [0, 0], sizes = [4, 32], strides = [1, 1]} : vector<4x96xf32> to vector<4x32xf32>
    %302 = vector.extract_strided_slice %298 {offsets = [0, 32], sizes = [4, 32], strides = [1, 1]} : vector<4x96xf32> to vector<4x32xf32>
    %303 = vector.extract_strided_slice %298 {offsets = [0, 64], sizes = [4, 32], strides = [1, 1]} : vector<4x96xf32> to vector<4x32xf32>
    %304 = arith.mulf %302, %267 : vector<4x32xf32>
    %305 = arith.mulf %301, %300 : vector<4x32xf32>
    %306 = arith.addf %304, %305 : vector<4x32xf32>
    %307 = math.tanh %306 : vector<4x32xf32>
    %308 = arith.mulf %303, %307 : vector<4x32xf32>
    %cst_55 = arith.constant dense<0.000000e+00> : vector<4x128xf32>
    %309 = tpu.matmul %308, %8, %cst_55 {dimension_numbers = #tpu.dot_dimension_numbers<[1], [0], [0], [1], [0, 0, 1, 1], [], []>} : vector<4x32xf32>, vector<32x128xf32>, vector<4x128xf32> -> vector<4x128xf32>
    %cst_56 = arith.constant dense<0.000000e+00> : vector<4x128xf32>
    %310 = tpu.matmul %289, %9, %cst_56 {dimension_numbers = #tpu.dot_dimension_numbers<[1], [0], [0], [1], [0, 0, 1, 1], [], []>} : vector<4x32xf32>, vector<32x128xf32>, vector<4x128xf32> -> vector<4x128xf32>
    %311 = arith.addf %309, %310 : vector<4x128xf32>
    %312 = arith.addf %311, %12 : vector<4x128xf32>
    %313 = vector.extract_strided_slice %312 {offsets = [0, 0], sizes = [4, 96], strides = [1, 1]} : vector<4x128xf32> to vector<4x96xf32>
    %314 = arith.negf %313 : vector<4x96xf32>
    %315 = math.exp %314 : vector<4x96xf32>
    %cst_57 = arith.constant 1.000000e+00 : f32
    %316 = vector.broadcast %cst_57 : f32 to vector<4x96xf32>
    %317 = arith.addf %316, %315 : vector<4x96xf32>
    %318 = arith.divf %316, %317 : vector<4x96xf32>
    %319 = vector.extract_strided_slice %312 {offsets = [0, 96], sizes = [4, 32], strides = [1, 1]} : vector<4x128xf32> to vector<4x32xf32>
    %320 = math.tanh %319 : vector<4x32xf32>
    %321 = vector.extract_strided_slice %318 {offsets = [0, 0], sizes = [4, 32], strides = [1, 1]} : vector<4x96xf32> to vector<4x32xf32>
    %322 = vector.extract_strided_slice %318 {offsets = [0, 32], sizes = [4, 32], strides = [1, 1]} : vector<4x96xf32> to vector<4x32xf32>
    %323 = vector.extract_strided_slice %318 {offsets = [0, 64], sizes = [4, 32], strides = [1, 1]} : vector<4x96xf32> to vector<4x32xf32>
    %324 = arith.mulf %322, %287 : vector<4x32xf32>
    %325 = arith.mulf %321, %320 : vector<4x32xf32>
    %326 = arith.addf %324, %325 : vector<4x32xf32>
    %327 = math.tanh %326 : vector<4x32xf32>
    %328 = arith.mulf %323, %327 : vector<4x32xf32>
    %c0_58 = arith.constant 0 : index
    %c0_59 = arith.constant 0 : index
    %329 = vector.load %arg7[%c0_58, %c0_59] : memref<1x32xf32, #tpu.memory_space<vmem>>, vector<1x32xf32>
    %330 = vector.broadcast %329 : vector<1x32xf32> to vector<4x32xf32>
    %331 = arith.mulf %328, %330 : vector<4x32xf32>
    %cst_60 = arith.constant dense<0.000000e+00> : vector<4xf32>
    %332 = vector.multi_reduction <add>, %331, %cst_60 [1] : vector<4x32xf32> to vector<4xf32>
    %333 = vector.shape_cast %332 : vector<4xf32> to vector<4x1xf32>
    %c0_61 = arith.constant 0 : index
    %c0_62 = arith.constant 0 : index
    %334 = vector.load %arg8[%c0_61, %c0_62] : memref<1x1xf32, #tpu.memory_space<vmem>>, vector<1x1xf32>
    %335 = vector.broadcast %334 : vector<1x1xf32> to vector<4x1xf32>
    %336 = arith.addf %333, %335 : vector<4x1xf32>
    %c0_63 = arith.constant 0 : index
    %c0_64 = arith.constant 0 : index
    %337 = vector.load %arg9[%c0_63, %c0_64] : memref<4x1xf32, #tpu.memory_space<vmem>>, vector<4x1xf32>
    tpu.vector_store %arg9[%c0_63, %c0_64], %336 {strides = array<i32>} : memref<4x1xf32, #tpu.memory_space<vmem>>, vector<4x1xf32>,
    return
  }
}

</mosaic_0001>

<bundles_post_ra>
// kernel: stock_model_forward.1
= control target key start
LH: loop header
LB: loop body
LE: loop exit
PB: predicated region body
PF: predicated region fallthrough
CT: control target
= control target key end

     0   :  { %v3127_v0 = vmov 0.0|0.0   ;;  %vm62_vm0 = vcmask 64512   ;;  %vm3128_vm1 = vmmov 0   ;;  %v3129_v4 = vmov 0.0   ;;  %s3130_s23 = smov 32   ;;  %s3590_s2 = inlined_call_operand.vmem [shape: f32[32,128], index: 2, kind: input, shape index: {}]   ;;  %s3591_s1 = inlined_call_operand.vmem [shape: f32[8,128], index: 1, kind: input, shape index: {}]   ;;  %s3592_s0 = inlined_call_operand.vmem [shape: f32[8,4,8], index: 0, kind: input, shape index: {}]   ;;  %s3593_s3 = inlined_call_operand.vmem [shape: f32[1,128], index: 3, kind: input, shape index: {}]   ;;  %s3594_s5 = inlined_call_operand.vmem [shape: f32[32,128], index: 5, kind: input, shape index: {}]   ;;  %s3595_s4 = inlined_call_operand.vmem [shape: f32[32,128], index: 4, kind: input, shape index: {}]   ;;  %s3596_s6 = inlined_call_operand.vmem [shape: f32[1,128], index: 6, kind: input, shape index: {}]   ;;  %s3597_s7 = inlined_call_operand.vmem [shape: f32[1,32], index: 7, kind: input, shape index: {}]   ;;  %s3598_s8 = inlined_call_operand.<no memory space> [shape: f32[1,1], index: 8, kind: input, shape index: {}]   ;;  %s3599_s9 = inlined_call_operand.vmem [shape: f32[4,1], index: 9, kind: output, shape index: {}]  }
   0x1   :  { %2846 = vmatprep.subr.bf16.mxu1 %v3127_v0  ;;  %v156_v1 = vld [vmem:[%s3590_s2] sm:$0xff]  ;;  %v157_v2 = vld [vmem:[%s3590_s2 + $0x8] sm:$0xff]  ;;  %2590 = vmatprep.mubr.msk.f32.mxu1 %vm3128_vm1, %v3129_v4  ;;  %v158_v8 = vld [vmem:[%s3590_s2 + $0x10] sm:$0xff]  ;;  %vm175_vm2 = vcmask 261120   ;;  %vm2385_vm3 = vcmask 257024   ;;  %vm2397_vm4 = vcmask 3072  }
   0x2   :  { %v42_v3 = vld [vmem:[%s3591_s1] sm:$0xff]  ;;  %v3194_v5 = vpack.c.bf16 %v157_v2, %v156_v1  ;;  %v2996_v7 = vld [vmem:[%s3592_s0 + $0x8] sm:$0xff]   ;;  %v159_v9 = vld [vmem:[%s3590_s2 + $0x18] sm:$0xff] }
   0x3   :  { %2574 = vmatprep.subr.mxu0 %v42_v3  ;;  %v2995_v6 = vld [vmem:[%s3592_s0] sm:$0xff]   ;;  %v3212_v10 = vpack.c.bf16 %v159_v9, %v158_v8  ;;  %v2997_v28 = vld [vmem:[%s3592_s0 + $0x10] sm:$0xff]   ;;  %v2998_v29 = vld [vmem:[%s3592_s0 + $0x18] sm:$0xff]  }
   0x4   :  { %2575 = vmatpush3.msra.mxu0 %v42_v3  ;;  %2848 = vmatpush3.bf16.msra.mxu1 %v3194_v5  ;;  %v3225_v12 = vld [vmem:[%s3593_s3] ss:$0 sm:$0xff]  ;;  %v165_v31 = vld [vmem:[%s3594_s5 + $0x8] sm:$0xff]  ;;  %v166_v32 = vld [vmem:[%s3594_s5 + $0x10] sm:$0xff] }
   0x5   :  { %2576 = vmatprep.mubr.msk.f32.mxu0 %vm62_vm0, %v2995_v6  ;;  %2849 = vmatprep.subr.bf16.mxu1 %v3127_v0  ;;  %v164_v30 = vld [vmem:[%s3594_s5] sm:$0xff]  ;;  %v167_v34 = vld [vmem:[%s3594_s5 + $0x18] sm:$0xff]  ;;  %v161_v36 = vld [vmem:[%s3595_s4 + $0x8] sm:$0xff] }
   0x6   :  { %2577 = vmatmul.mubr.msk.f32.vlgmr.msra.gmra.mrb[0].mxu0 %vm62_vm0, %v2996_v7  ;;  %2852 = vmatprep.subr.bf16.mxu0 %v3127_v0  ;;  %v3251_v33 = vpack.c.bf16 %v165_v31, %v164_v30  ;;  %v160_v35 = vld [vmem:[%s3595_s4] sm:$0xff]  ;;  %v162_v38 = vld [vmem:[%s3595_s4 + $0x10] sm:$0xff]  ;;  %v163_v39 = vld [vmem:[%s3595_s4 + $0x18] sm:$0xff]  ;;  %v3273_v40 = vpack.c.bf16 %v167_v34, %v166_v32  ;;  %s3131_s4 = smov 64  }
   0x7   :  { %2579 = vmatprep.mubr.msk.f32.mxu0 %vm62_vm0, %v2997_v28  ;;  %v3264_v37 = vpack.c.bf16 %v161_v36, %v160_v35  ;;  %v3279_v41 = vpack.c.bf16 %v163_v39, %v162_v38  ;;  %v3316_v50 = vld [vmem:[%s3596_s6] ss:$0 sm:$0xff] }
   0x8   :  { %2851 = vmatpush3.bf16.msra.mxu1 %v3212_v10  ;;  %2854 = vmatpush3.bf16.msra.mxu0 %v3251_v33 }
   0x9   :  { %2858 = vmatprep.subr.bf16.mxu1 %v3127_v0  ;;  %2855 = vmatprep.subr.bf16.mxu0 %v3127_v0 }
   0xa   :  { %2580 = vmatmul.mubr.msk.f32.gmra.mrb[2].mxu0 %vm62_vm0, %v2998_v29 }
   0xb   :  { %2591 = vmatmul.mubr.f32.vlgmr.msra.gmra.mrb[0].mxu1 %v3129_v4  ;;  %2601 = vmatprep.mubr.msk.f32.mxu0 %vm3128_vm1, %v3129_v4 }
   0xc   :  { %2612 = vmatprep.mubr.msk.f32.mxu1 %vm3128_vm1, %v3129_v4  ;;  %2860 = vmatpush3.bf16.msra.mxu1 %v3264_v37 }
   0xd   :  { %2861 = vmatprep.subr.bf16.mxu1 %v3127_v0  ;;  %2857 = vmatpush3.bf16.msra.mxu0 %v3273_v40 }
   0xe   :  { %2864 = vmatprep.subr.bf16.mxu0 %v3127_v0 }
  0x10   :  { %2863 = vmatpush3.bf16.msra.mxu1 %v3279_v41  ;;  %2602 = vmatmul.mubr.f32.vlgmr.msra.gmra.mrb[4].mxu0 %v3129_v4 }
  0x11   :  { %2870 = vmatprep.subr.bf16.mxu1 %v3127_v0  ;;  %2866 = vmatpush3.bf16.msra.mxu0 %v3194_v5 }
  0x12   :  { %2623 = vmatprep.mubr.msk.f32.mxu0 %vm3128_vm1, %v3129_v4  ;;  %2867 = vmatprep.subr.bf16.mxu0 %v3127_v0 }
  0x15   :  { %2869 = vmatpush3.bf16.msra.mxu0 %v3212_v10 }
  0x16   :  { %2876 = vmatprep.subr.bf16.mxu0 %v3127_v0 }
  0xd9   :  { %v3220_v11 = vpop.f32.mrb[0].mxu0 }
  0xda   :  { %v137_v13 = vpop.f32.mrb[1].mxu0  ;;  %v3359_v39 = vadd.f32 %v3220_v11, %v3225_v12 }
  0xdb   :  { %v3228_v14 = vadd.f32 %v3225_v12, %v137_v13 }
  0xdd   :  { %v3295_v45 = vpop.f32.mrb[2].mxu0 }
  0xde   :  { %v245_v15 = vpop.f32.mrb[0].mxu1  ;;  %v3297_v46 = vpop.f32.mrb[3].mxu0 }
  0xdf   :  { %v249_v16 = vadd.f32 %v245_v15, %v3228_v14  ;;  %v2592_v17 = vpop.f32.mrb[1].mxu1 }
  0xe1   :  { %2999 = vtanh.f32 %v249_v16  ;;  %v2409_v19 = vmul.f32 -1.442695, %v249_v16 }
  0xe3   :  { %3001 = vpow2.f32 %v2409_v19  ;;  %v340_v47 = vpop.f32.mrb[4].mxu0 }
  0xe4   :  { %v2603_v48 = vpop.f32.mrb[5].mxu0 }
  0xeb   :  { %v3000_v18 = vpop.eup %2999 }
  0xec   :  { %259 = vrot.lane.b32.xlu0 %v3000_v18, %s3130_s23 }
  0xed   :  { %v3002_v20 = vpop.eup %3001 }
  0xee   :  { %v253_v21 = vadd.f32 1.0, %v3002_v20 }
  0xf0   :  { %3003 = vrcp.f32 %v253_v21 }
  0xfa   :  { %v3004_v22 = vpop.eup %3003 }
  0xfb   :  { %v257_v25 = vmul.f32 0.0, %v3004_v22 }
 0x15e   :  { %v260_v23 = vpop.permute.xlu0 %259 }
 0x15f   :  { %v262_v24 = vmul.f32 %v3004_v22, %v260_v23 }
 0x161   :  { %264 = vrot.lane.b32.xlu0 %v262_v24, %s3130_s23 }
 0x1d3   :  { %v265_v26 = vpop.permute.xlu0 %264 }
 0x1d4   :  { %v3233_v27 = vadd.f32 %v265_v26, %v257_v25 }
 0x1d6   :  { %3005 = vtanh.f32 %v3233_v27  ;;  %v526_v15 = vrot.slane %v3233_v27, 4 }
 0x1e0   :  { %v3006_v42 = vpop.eup %3005 }
 0x1e1   :  { %270 = vrot.lane.b32.xlu1 %v3006_v42, %s3130_s23 }
 0x253   :  { %v271_v43 = vpop.permute.xlu1 %270 }
 0x254   :  { %v273_v44 = vmul.f32 %v3004_v22, %v271_v43 }
 0x256   :  { %345 = vrot.lane.b32.xlu1 %v273_v44, %s3131_s4 }
 0x2c8   :  { %v346_v49 = vpop.permute.xlu1 %345 }
 0x2c9   :  { %2613 = vmatmul.mubr.msk.f32.vlgmr.msra.gmra.mrb[2].mxu1 %vm175_vm2, %v346_v49  ;;  %2624 = vmatmul.mubr.msk.f32.vlgmr.msra.gmra.mrb[6].mxu0 %vm175_vm2, %v346_v49 }
 0x2ca   :  { %2872 = vmatpush3.bf16.msra.mxu1 %v3251_v33  ;;  %2878 = vmatpush3.bf16.msra.mxu0 %v3264_v37 }
 0x2cb   :  { %2873 = vmatprep.subr.bf16.mxu1 %v3127_v0  ;;  %2879 = vmatprep.subr.bf16.mxu0 %v3127_v0 }
 0x2cc   :  { %2634 = vmatprep.mubr.msk.f32.mxu1 %vm3128_vm1, %v3129_v4  ;;  %2645 = vmatprep.mubr.msk.f32.mxu0 %vm3128_vm1, %v3129_v4 }
 0x2ce   :  { %2875 = vmatpush3.bf16.msra.mxu1 %v3273_v40  ;;  %2881 = vmatpush3.bf16.msra.mxu0 %v3279_v41 }
 0x2cf   :  { %2882 = vmatprep.subr.bf16.mxu1 %v3127_v0  ;;  %2888 = vmatprep.subr.bf16.mxu0 %v3127_v0 }
 0x39c   :  { %v415_v51 = vpop.f32.mrb[2].mxu1  ;;  %v510_v52 = vpop.f32.mrb[6].mxu0 }
 0x39d   :  { %v416_v53 = vadd.f32 %v415_v51, %v340_v47  ;;  %v515_v54 = vrot.slane %v510_v52, 4  ;;  %v2614_v55 = vpop.f32.mrb[3].mxu1  ;;  %v2625_v56 = vpop.f32.mrb[7].mxu0 }
 0x39f   :  { %v419_v57 = vadd.f32 %v3316_v50, %v416_v53  ;;  %v517_v58 = vadd.f32 %v515_v54, %v3228_v14 }
 0x3a1   :  { %3007 = vtanh.f32 %v419_v57  ;;  %v2411_v61 = vmul.f32 -1.442695, %v419_v57  ;;  %v2413_v62 = vmul.f32 -1.442695, %v517_v58 }
 0x3a2   :  { %3009 = vtanh.f32 %v517_v58 }
 0x3a3   :  { %3011 = vpow2.f32 %v2411_v61 }
 0x3a4   :  { %3013 = vpow2.f32 %v2413_v62 }
 0x3ab   :  { %v3008_v59 = vpop.eup %3007 }
 0x3ac   :  { %v3010_v60 = vpop.eup %3009  ;;  %429 = vrot.lane.b32.xlu1 %v3008_v59, %s3130_s23 }
 0x3ad   :  { %530 = vrot.lane.b32.xlu0 %v3010_v60, %s3130_s23  ;;  %v3012_v63 = vpop.eup %3011 }
 0x3ae   :  { %v3014_v1 = vpop.eup %3013  ;;  %v423_v2 = vadd.f32 1.0, %v3012_v63 }
 0x3af   :  { %v521_v3 = vadd.f32 1.0, %v3014_v1 }
 0x3b0   :  { %3015 = vrcp.f32 %v423_v2 }
 0x3b1   :  { %3017 = vrcp.f32 %v521_v3 }
 0x3ba   :  { %v3016_v6 = vpop.eup %3015 }
 0x3bb   :  { %v3018_v8 = vpop.eup %3017  ;;  %v427_v16 = vmul.f32 0.0, %v3016_v6 }
 0x3bc   :  { %v528_v17 = vmul.f32 %v3018_v8, %v526_v15 }
 0x41e   :  { %v430_v7 = vpop.permute.xlu1 %429 }
 0x41f   :  { %v531_v9 = vpop.permute.xlu0 %530  ;;  %v432_v13 = vmul.f32 %v3016_v6, %v430_v7 }
 0x420   :  { %v533_v14 = vmul.f32 %v3018_v8, %v531_v9 }
 0x421   :  { %434 = vrot.lane.b32.xlu1 %v432_v13, %s3130_s23 }
 0x422   :  { %535 = vrot.lane.b32.xlu0 %v533_v14, %s3130_s23 }
 0x493   :  { %v435_v18 = vpop.permute.xlu1 %434 }
 0x494   :  { %v536_v19 = vpop.permute.xlu0 %535  ;;  %v3325_v20 = vadd.f32 %v435_v18, %v427_v16 }
 0x495   :  { %v3327_v21 = vadd.f32 %v536_v19, %v528_v17 }
 0x496   :  { %3019 = vtanh.f32 %v3325_v20 }
 0x497   :  { %3021 = vtanh.f32 %v3327_v21  ;;  %v800_v62 = vrot.slane %v3327_v21, 4 }
 0x4a0   :  { %v3020_v22 = vpop.eup %3019 }
 0x4a1   :  { %v3022_v23 = vpop.eup %3021  ;;  %440 = vrot.lane.b32.xlu1 %v3020_v22, %s3130_s23 }
 0x4a2   :  { %541 = vrot.lane.b32.xlu0 %v3022_v23, %s3130_s23 }
 0x513   :  { %v441_v24 = vpop.permute.xlu1 %440 }
 0x514   :  { %v542_v25 = vpop.permute.xlu0 %541  ;;  %v443_v26 = vmul.f32 %v3016_v6, %v441_v24 }
 0x515   :  { %v544_v27 = vmul.f32 %v3018_v8, %v542_v25 }
 0x516   :  { %546 = vrot.lane.b32.xlu0 %v443_v26, %s3131_s4 }
 0x517   :  { %v621_v28 = vrot.slane %v544_v27, 4 }
 0x519   :  { %622 = vrot.lane.b32.xlu1 %v621_v28, %s3131_s4 }
 0x588   :  { %v547_v29 = vpop.permute.xlu0 %546 }
 0x589   :  { %2635 = vmatmul.mubr.msk.f32.vlgmr.msra.gmra.mrb[4].mxu1 %vm175_vm2, %v547_v29 }
 0x58a   :  { %2884 = vmatpush3.bf16.msra.mxu1 %v3194_v5  ;;  %2656 = vmatprep.mubr.msk.f32.mxu1 %vm3128_vm1, %v3129_v4 }
 0x58b   :  { %v623_v30 = vpop.permute.xlu1 %622  ;;  %2885 = vmatprep.subr.bf16.mxu1 %v3127_v0 }
 0x58c   :  { %2646 = vmatmul.mubr.msk.f32.vlgmr.msra.gmra.mrb[8].mxu0 %vm175_vm2, %v623_v30 }
 0x58d   :  { %2890 = vmatpush3.bf16.msra.mxu0 %v3251_v33  ;;  %2667 = vmatprep.mubr.msk.f32.mxu0 %vm3128_vm1, %v3129_v4 }
 0x58e   :  { %2887 = vmatpush3.bf16.msra.mxu1 %v3212_v10  ;;  %2891 = vmatprep.subr.bf16.mxu0 %v3127_v0 }
 0x58f   :  { %2894 = vmatprep.subr.bf16.mxu1 %v3127_v0 }
 0x591   :  { %2657 = vmatmul.mubr.msk.f32.vlgmr.msra.gmra.mrb[6].mxu1 %vm175_vm2, %v623_v30  ;;  %2893 = vmatpush3.bf16.msra.mxu0 %v3273_v40 }
 0x592   :  { %2896 = vmatpush3.bf16.msra.mxu1 %v3264_v37  ;;  %2900 = vmatprep.subr.bf16.mxu0 %v3127_v0 }
 0x593   :  { %2897 = vmatprep.subr.bf16.mxu1 %v3127_v0  ;;  %2678 = vmatprep.mubr.msk.f32.mxu1 %vm3128_vm1, %v3129_v4 }
 0x596   :  { %2899 = vmatpush3.bf16.msra.mxu1 %v3279_v41 }
 0x597   :  { %2906 = vmatprep.subr.bf16.mxu1 %v3127_v0 }
 0x65c   :  { %v616_v31 = vpop.f32.mrb[4].mxu1 }
 0x65d   :  { %v2636_v32 = vpop.f32.mrb[5].mxu1 }
 0x65f   :  { %v692_v34 = vpop.f32.mrb[8].mxu0 }
 0x660   :  { %v693_v35 = vadd.f32 %v692_v34, %v616_v31  ;;  %v2647_v36 = vpop.f32.mrb[9].mxu0 }
 0x662   :  { %v696_v38 = vadd.f32 %v3316_v50, %v693_v35 }
 0x664   :  { %3023 = vtanh.f32 %v696_v38  ;;  %v787_v42 = vpop.f32.mrb[6].mxu1  ;;  %v2416_v49 = vmul.f32 -1.442695, %v696_v38 }
 0x665   :  { %v791_v43 = vadd.f32 %v787_v42, %v3359_v39  ;;  %v2658_v44 = vpop.f32.mrb[7].mxu1 }
 0x667   :  { %3025 = vtanh.f32 %v791_v43  ;;  %v2418_v51 = vmul.f32 -1.442695, %v791_v43 }
 0x668   :  { %3027 = vpow2.f32 %v2416_v49 }
 0x669   :  { %3029 = vpow2.f32 %v2418_v51 }
 0x66e   :  { %v3024_v47 = vpop.eup %3023 }
 0x66f   :  { %706 = vrot.lane.b32.xlu0 %v3024_v47, %s3130_s23 }
 0x671   :  { %v3026_v48 = vpop.eup %3025 }
 0x672   :  { %804 = vrot.lane.b32.xlu1 %v3026_v48, %s3130_s23  ;;  %v3028_v52 = vpop.eup %3027 }
 0x673   :  { %v3030_v53 = vpop.eup %3029  ;;  %v700_v11 = vadd.f32 1.0, %v3028_v52 }
 0x674   :  { %v795_v54 = vadd.f32 1.0, %v3030_v53 }
 0x675   :  { %3031 = vrcp.f32 %v700_v11 }
 0x676   :  { %3033 = vrcp.f32 %v795_v54 }
 0x67f   :  { %v3032_v55 = vpop.eup %3031 }
 0x680   :  { %v3034_v58 = vpop.eup %3033  ;;  %v704_v61 = vmul.f32 %v3032_v55, %v3325_v20 }
 0x681   :  { %v802_v2 = vmul.f32 %v3034_v58, %v800_v62 }
 0x6e1   :  { %v707_v56 = vpop.permute.xlu0 %706 }
 0x6e2   :  { %v709_v57 = vmul.f32 %v3032_v55, %v707_v56 }
 0x6e4   :  { %711 = vrot.lane.b32.xlu0 %v709_v57, %s3130_s23  ;;  %v805_v59 = vpop.permute.xlu1 %804 }
 0x6e5   :  { %v807_v60 = vmul.f32 %v3034_v58, %v805_v59 }
 0x6e7   :  { %809 = vrot.lane.b32.xlu1 %v807_v60, %s3130_s23 }
 0x756   :  { %v712_v63 = vpop.permute.xlu0 %711 }
 0x757   :  { %v3368_v1 = vadd.f32 %v712_v63, %v704_v61 }
 0x759   :  { %3035 = vtanh.f32 %v3368_v1  ;;  %v810_v3 = vpop.permute.xlu1 %809 }
 0x75a   :  { %v3371_v6 = vadd.f32 %v810_v3, %v802_v2  ;;  %v3440_v3 = vadd.f32 %v3225_v12, %v3297_v46 }
 0x75c   :  { %3037 = vtanh.f32 %v3371_v6  ;;  %v1076_v52 = vrot.slane %v3371_v6, 4 }
 0x763   :  { %v3036_v7 = vpop.eup %3035 }
 0x764   :  { %717 = vrot.lane.b32.xlu0 %v3036_v7, %s3130_s23 }
 0x766   :  { %v3038_v8 = vpop.eup %3037 }
 0x767   :  { %815 = vrot.lane.b32.xlu1 %v3038_v8, %s3130_s23 }
 0x7d6   :  { %v718_v9 = vpop.permute.xlu0 %717 }
 0x7d7   :  { %v720_v13 = vmul.f32 %v3032_v55, %v718_v9 }
 0x7d9   :  { %820 = vrot.lane.b32.xlu0 %v720_v13, %s3131_s4  ;;  %v816_v14 = vpop.permute.xlu1 %815 }
 0x7da   :  { %v818_v15 = vmul.f32 %v3034_v58, %v816_v14 }
 0x7dc   :  { %895 = vrot.lane.b32.xlu1 %v818_v15, %s3131_s4 }
 0x84b   :  { %v821_v16 = vpop.permute.xlu0 %820 }
 0x84c   :  { %2668 = vmatmul.mubr.msk.f32.vlgmr.msra.gmra.mrb[10].mxu0 %vm175_vm2, %v821_v16 }
 0x84d   :  { %2902 = vmatpush3.bf16.msra.mxu0 %v3194_v5  ;;  %2689 = vmatprep.mubr.msk.f32.mxu0 %vm3128_vm1, %v3129_v4 }
 0x84e   :  { %v896_v17 = vpop.permute.xlu1 %895  ;;  %2903 = vmatprep.subr.bf16.mxu0 %v3127_v0 }
 0x84f   :  { %2679 = vmatmul.mubr.msk.f32.vlgmr.msra.gmra.mrb[8].mxu1 %vm175_vm2, %v896_v17 }
 0x850   :  { %2908 = vmatpush3.bf16.msra.mxu1 %v3251_v33  ;;  %2700 = vmatprep.mubr.msk.f32.mxu1 %vm3128_vm1, %v3129_v4 }
 0x851   :  { %2905 = vmatpush3.bf16.msra.mxu0 %v3212_v10  ;;  %2909 = vmatprep.subr.bf16.mxu1 %v3127_v0 }
 0x852   :  { %2912 = vmatprep.subr.bf16.mxu0 %v3127_v0 }
 0x854   :  { %2690 = vmatmul.mubr.msk.f32.vlgmr.msra.gmra.mrb[12].mxu0 %vm175_vm2, %v896_v17  ;;  %2911 = vmatpush3.bf16.msra.mxu1 %v3273_v40 }
 0x855   :  { %2914 = vmatpush3.bf16.msra.mxu0 %v3264_v37  ;;  %2918 = vmatprep.subr.bf16.mxu1 %v3127_v0 }
 0x856   :  { %2915 = vmatprep.subr.bf16.mxu0 %v3127_v0  ;;  %2711 = vmatprep.mubr.msk.f32.mxu0 %vm3128_vm1, %v3129_v4 }
 0x859   :  { %2917 = vmatpush3.bf16.msra.mxu0 %v3279_v41 }
 0x85a   :  { %2924 = vmatprep.subr.bf16.mxu0 %v3127_v0 }
 0x91f   :  { %v890_v18 = vpop.f32.mrb[10].mxu0 }
 0x920   :  { %v2669_v19 = vpop.f32.mrb[11].mxu0 }
 0x922   :  { %v965_v20 = vpop.f32.mrb[8].mxu1 }
 0x923   :  { %v966_v21 = vadd.f32 %v965_v20, %v890_v18  ;;  %v2680_v22 = vpop.f32.mrb[9].mxu1 }
 0x925   :  { %v969_v23 = vadd.f32 %v3316_v50, %v966_v21 }
 0x927   :  { %3039 = vtanh.f32 %v969_v23  ;;  %v1060_v24 = vpop.f32.mrb[12].mxu0  ;;  %v2421_v30 = vmul.f32 -1.442695, %v969_v23 }
 0x928   :  { %v1065_v25 = vrot.slane %v1060_v24, 4  ;;  %v2691_v26 = vpop.f32.mrb[13].mxu0 }
 0x92a   :  { %v1067_v27 = vadd.f32 %v1065_v25, %v3359_v39 }
 0x92c   :  { %3041 = vtanh.f32 %v1067_v27  ;;  %v2423_v31 = vmul.f32 -1.442695, %v1067_v27 }
 0x92d   :  { %3043 = vpow2.f32 %v2421_v30 }
 0x92e   :  { %3045 = vpow2.f32 %v2423_v31 }
 0x931   :  { %v3040_v28 = vpop.eup %3039 }
 0x932   :  { %979 = vrot.lane.b32.xlu1 %v3040_v28, %s3130_s23 }
 0x936   :  { %v3042_v29 = vpop.eup %3041 }
 0x937   :  { %1080 = vrot.lane.b32.xlu0 %v3042_v29, %s3130_s23  ;;  %v3044_v32 = vpop.eup %3043 }
 0x938   :  { %v973_v34 = vadd.f32 1.0, %v3044_v32  ;;  %v3046_v35 = vpop.eup %3045 }
 0x939   :  { %v1071_v36 = vadd.f32 1.0, %v3046_v35 }
 0x93a   :  { %3047 = vrcp.f32 %v973_v34 }
 0x93b   :  { %3049 = vrcp.f32 %v1071_v36 }
 0x944   :  { %v3048_v38 = vpop.eup %3047 }
 0x945   :  { %v3050_v43 = vpop.eup %3049  ;;  %v977_v48 = vmul.f32 %v3048_v38, %v3368_v1 }
 0x946   :  { %v1078_v53 = vmul.f32 %v3050_v43, %v1076_v52 }
 0x9a4   :  { %v980_v42 = vpop.permute.xlu1 %979 }
 0x9a5   :  { %v982_v39 = vmul.f32 %v3048_v38, %v980_v42 }
 0x9a7   :  { %984 = vrot.lane.b32.xlu1 %v982_v39, %s3130_s23 }
 0x9a9   :  { %v1081_v44 = vpop.permute.xlu0 %1080 }
 0x9aa   :  { %v1083_v47 = vmul.f32 %v3050_v43, %v1081_v44 }
 0x9ac   :  { %1085 = vrot.lane.b32.xlu0 %v1083_v47, %s3130_s23 }
 0xa19   :  { %v985_v49 = vpop.permute.xlu1 %984 }
 0xa1a   :  { %v3406_v51 = vadd.f32 %v985_v49, %v977_v48 }
 0xa1c   :  { %3051 = vtanh.f32 %v3406_v51 }
 0xa1e   :  { %v1086_v11 = vpop.permute.xlu0 %1085 }
 0xa1f   :  { %v3410_v54 = vadd.f32 %v1086_v11, %v1078_v53 }
 0xa21   :  { %3053 = vtanh.f32 %v3410_v54  ;;  %v1350_v29 = vrot.slane %v3410_v54, 4 }
 0xa26   :  { %v3052_v55 = vpop.eup %3051 }
 0xa27   :  { %990 = vrot.lane.b32.xlu1 %v3052_v55, %s3130_s23 }
 0xa2b   :  { %v3054_v56 = vpop.eup %3053 }
 0xa2c   :  { %1091 = vrot.lane.b32.xlu0 %v3054_v56, %s3130_s23 }
 0xa99   :  { %v991_v57 = vpop.permute.xlu1 %990 }
 0xa9a   :  { %v993_v58 = vmul.f32 %v3048_v38, %v991_v57 }
 0xa9c   :  { %1096 = vrot.lane.b32.xlu0 %v993_v58, %s3131_s4 }
 0xa9e   :  { %v1092_v59 = vpop.permute.xlu0 %1091 }
 0xa9f   :  { %v1094_v60 = vmul.f32 %v3050_v43, %v1092_v59 }
 0xaa1   :  { %v1171_v61 = vrot.slane %v1094_v60, 4 }
 0xaa3   :  { %1172 = vrot.lane.b32.xlu1 %v1171_v61, %s3131_s4 }
 0xb0e   :  { %v1097_v62 = vpop.permute.xlu0 %1096 }
 0xb0f   :  { %2701 = vmatmul.mubr.msk.f32.vlgmr.msra.gmra.mrb[10].mxu1 %vm175_vm2, %v1097_v62 }
 0xb10   :  { %2920 = vmatpush3.bf16.msra.mxu1 %v3194_v5  ;;  %2722 = vmatprep.mubr.msk.f32.mxu1 %vm3128_vm1, %v3129_v4 }
 0xb11   :  { %2921 = vmatprep.subr.bf16.mxu1 %v3127_v0 }
 0xb14   :  { %2923 = vmatpush3.bf16.msra.mxu1 %v3212_v10 }
 0xb15   :  { %v1173_v63 = vpop.permute.xlu1 %1172  ;;  %2930 = vmatprep.subr.bf16.mxu1 %v3127_v0 }
 0xb16   :  { %2712 = vmatmul.mubr.msk.f32.vlgmr.msra.gmra.mrb[14].mxu0 %vm175_vm2, %v1173_v63 }
 0xb17   :  { %2723 = vmatmul.mubr.msk.f32.vlgmr.msra.gmra.mrb[12].mxu1 %vm175_vm2, %v1173_v63  ;;  %2926 = vmatpush3.bf16.msra.mxu0 %v3251_v33 }
 0xb18   :  { %2932 = vmatpush3.bf16.msra.mxu1 %v3264_v37  ;;  %2927 = vmatprep.subr.bf16.mxu0 %v3127_v0 }
 0xb19   :  { %2933 = vmatprep.subr.bf16.mxu1 %v3127_v0  ;;  %2744 = vmatprep.mubr.msk.f32.mxu1 %vm3128_vm1, %v3129_v4 }
 0xb1a   :  { %2733 = vmatprep.mubr.msk.f32.mxu0 %vm3128_vm1, %v3129_v4 }
 0xb1b   :  { %2929 = vmatpush3.bf16.msra.mxu0 %v3273_v40 }
 0xb1c   :  { %2935 = vmatpush3.bf16.msra.mxu1 %v3279_v41  ;;  %2936 = vmatprep.subr.bf16.mxu0 %v3127_v0 }
 0xb1d   :  { %2942 = vmatprep.subr.bf16.mxu1 %v3127_v0 }
 0xbe2   :  { %v1166_v1 = vpop.f32.mrb[10].mxu1 }
 0xbe3   :  { %v2702_v2 = vpop.f32.mrb[11].mxu1 }
 0xbe9   :  { %v1242_v6 = vpop.f32.mrb[14].mxu0 }
 0xbea   :  { %v1243_v7 = vadd.f32 %v1242_v6, %v1166_v1  ;;  %v2713_v8 = vpop.f32.mrb[15].mxu0  ;;  %v1337_v9 = vpop.f32.mrb[12].mxu1 }
 0xbeb   :  { %v1341_v13 = vadd.f32 %v1337_v9, %v3440_v3  ;;  %v2724_v14 = vpop.f32.mrb[13].mxu1 }
 0xbec   :  { %v1246_v15 = vadd.f32 %v3316_v50, %v1243_v7 }
 0xbed   :  { %3055 = vtanh.f32 %v1341_v13  ;;  %v2428_v18 = vmul.f32 -1.442695, %v1341_v13 }
 0xbee   :  { %3057 = vtanh.f32 %v1246_v15  ;;  %v2426_v46 = vmul.f32 -1.442695, %v1246_v15 }
 0xbef   :  { %3059 = vpow2.f32 %v2428_v18 }
 0xbf0   :  { %3061 = vpow2.f32 %v2426_v46 }
 0xbf7   :  { %v3056_v16 = vpop.eup %3055 }
 0xbf8   :  { %v3058_v17 = vpop.eup %3057  ;;  %1354 = vrot.lane.b32.xlu1 %v3056_v16, %s3130_s23 }
 0xbf9   :  { %1256 = vrot.lane.b32.xlu0 %v3058_v17, %s3130_s23  ;;  %v3060_v19 = vpop.eup %3059 }
 0xbfa   :  { %v3062_v20 = vpop.eup %3061  ;;  %v1345_v21 = vadd.f32 1.0, %v3060_v19 }
 0xbfb   :  { %v1250_v22 = vadd.f32 1.0, %v3062_v20 }
 0xbfc   :  { %3063 = vrcp.f32 %v1345_v21 }
 0xbfd   :  { %3065 = vrcp.f32 %v1250_v22 }
 0xc06   :  { %v3064_v23 = vpop.eup %3063 }
 0xc07   :  { %v3066_v25 = vpop.eup %3065  ;;  %v1352_v30 = vmul.f32 %v3064_v23, %v1350_v29 }
 0xc08   :  { %v1254_v32 = vmul.f32 %v3066_v25, %v3406_v51 }
 0xc6a   :  { %v1355_v24 = vpop.permute.xlu1 %1354 }
 0xc6b   :  { %v1357_v26 = vmul.f32 %v3064_v23, %v1355_v24  ;;  %v1257_v27 = vpop.permute.xlu0 %1256 }
 0xc6c   :  { %v1259_v28 = vmul.f32 %v3066_v25, %v1257_v27 }
 0xc6d   :  { %1359 = vrot.lane.b32.xlu1 %v1357_v26, %s3130_s23 }
 0xc6e   :  { %1261 = vrot.lane.b32.xlu0 %v1259_v28, %s3130_s23 }
 0xcdf   :  { %v1360_v31 = vpop.permute.xlu1 %1359 }
 0xce0   :  { %v3450_v34 = vadd.f32 %v1360_v31, %v1352_v30  ;;  %v1262_v35 = vpop.permute.xlu0 %1261 }
 0xce1   :  { %v3452_v36 = vadd.f32 %v1262_v35, %v1254_v32 }
 0xce2   :  { %3067 = vtanh.f32 %v3450_v34  ;;  %v1626_v46 = vrot.slane %v3450_v34, 4  ;;  %v3522_v34 = vadd.f32 %v3295_v45, %v3225_v12 }
 0xce3   :  { %3069 = vtanh.f32 %v3452_v36 }
 0xcec   :  { %v3068_v38 = vpop.eup %3067 }
 0xced   :  { %v3070_v42 = vpop.eup %3069  ;;  %1365 = vrot.lane.b32.xlu1 %v3068_v38, %s3130_s23 }
 0xcee   :  { %1267 = vrot.lane.b32.xlu0 %v3070_v42, %s3130_s23 }
 0xd5f   :  { %v1366_v39 = vpop.permute.xlu1 %1365 }
 0xd60   :  { %v1368_v43 = vmul.f32 %v3064_v23, %v1366_v39  ;;  %v1268_v44 = vpop.permute.xlu0 %1267 }
 0xd61   :  { %v1270_v47 = vmul.f32 %v3066_v25, %v1268_v44 }
 0xd62   :  { %1445 = vrot.lane.b32.xlu1 %v1368_v43, %s3131_s4 }
 0xd63   :  { %1370 = vrot.lane.b32.xlu0 %v1270_v47, %s3131_s4 }
 0xdd4   :  { %v1446_v48 = vpop.permute.xlu1 %1445 }
 0xdd5   :  { %v1371_v49 = vpop.permute.xlu0 %1370  ;;  %2745 = vmatmul.mubr.msk.f32.vlgmr.msra.gmra.mrb[14].mxu1 %vm175_vm2, %v1446_v48 }
 0xdd6   :  { %2734 = vmatmul.mubr.msk.f32.vlgmr.msra.gmra.mrb[16].mxu0 %vm175_vm2, %v1371_v49  ;;  %2944 = vmatpush3.bf16.msra.mxu1 %v3251_v33 }
 0xdd7   :  { %2938 = vmatpush3.bf16.msra.mxu0 %v3194_v5  ;;  %2755 = vmatprep.mubr.msk.f32.mxu0 %vm3128_vm1, %v3129_v4 }
 0xdd8   :  { %2939 = vmatprep.subr.bf16.mxu0 %v3127_v0  ;;  %2945 = vmatprep.subr.bf16.mxu1 %v3127_v0 }
 0xdd9   :  { %2766 = vmatprep.mubr.msk.f32.mxu1 %vm3128_vm1, %v3129_v4 }
 0xdda   :  { %2947 = vmatpush3.bf16.msra.mxu1 %v3273_v40 }
 0xddb   :  { %2941 = vmatpush3.bf16.msra.mxu0 %v3212_v10  ;;  %2954 = vmatprep.subr.bf16.mxu1 %v3127_v0 }
 0xddc   :  { %2948 = vmatprep.subr.bf16.mxu0 %v3127_v0 }
 0xdde   :  { %2756 = vmatmul.mubr.msk.f32.vlgmr.msra.gmra.mrb[18].mxu0 %vm175_vm2, %v1446_v48 }
 0xddf   :  { %2950 = vmatpush3.bf16.msra.mxu0 %v3264_v37  ;;  %2777 = vmatprep.mubr.msk.f32.mxu0 %vm3128_vm1, %v3129_v4 }
 0xde0   :  { %2951 = vmatprep.subr.bf16.mxu0 %v3127_v0 }
 0xde3   :  { %2953 = vmatpush3.bf16.msra.mxu0 %v3279_v41 }
 0xde4   :  { %2960 = vmatprep.subr.bf16.mxu0 %v3127_v0 }
 0xea8   :  { %v1515_v51 = vpop.f32.mrb[14].mxu1 }
 0xea9   :  { %v1440_v52 = vpop.f32.mrb[16].mxu0  ;;  %v2746_v53 = vpop.f32.mrb[15].mxu1 }
 0xeaa   :  { %v1516_v11 = vadd.f32 %v1515_v51, %v1440_v52  ;;  %v2735_v54 = vpop.f32.mrb[17].mxu0 }
 0xeac   :  { %v1519_v55 = vadd.f32 %v3316_v50, %v1516_v11 }
 0xeae   :  { %3071 = vtanh.f32 %v1519_v55  ;;  %v2431_v62 = vmul.f32 -1.442695, %v1519_v55 }
 0xeb1   :  { %v1610_v56 = vpop.f32.mrb[18].mxu0 }
 0xeb2   :  { %v1615_v57 = vrot.slane %v1610_v56, 4  ;;  %v2757_v58 = vpop.f32.mrb[19].mxu0 }
 0xeb4   :  { %v1617_v59 = vadd.f32 %v1615_v57, %v3440_v3 }
 0xeb6   :  { %3073 = vtanh.f32 %v1617_v59  ;;  %v2433_v63 = vmul.f32 -1.442695, %v1617_v59 }
 0xeb7   :  { %3075 = vpow2.f32 %v2431_v62 }
 0xeb8   :  { %v3072_v60 = vpop.eup %3071  ;;  %3077 = vpow2.f32 %v2433_v63 }
 0xeb9   :  { %1529 = vrot.lane.b32.xlu1 %v3072_v60, %s3130_s23 }
 0xec0   :  { %v3074_v61 = vpop.eup %3073 }
 0xec1   :  { %1630 = vrot.lane.b32.xlu0 %v3074_v61, %s3130_s23  ;;  %v3076_v1 = vpop.eup %3075 }
 0xec2   :  { %v1523_v2 = vadd.f32 1.0, %v3076_v1  ;;  %v3078_v6 = vpop.eup %3077 }
 0xec3   :  { %v1621_v7 = vadd.f32 1.0, %v3078_v6 }
 0xec4   :  { %3079 = vrcp.f32 %v1523_v2 }
 0xec5   :  { %3081 = vrcp.f32 %v1621_v7 }
 0xece   :  { %v3080_v8 = vpop.eup %3079 }
 0xecf   :  { %v3082_v13 = vpop.eup %3081  ;;  %v1527_v16 = vmul.f32 %v3080_v8, %v3452_v36 }
 0xed0   :  { %v1628_v19 = vmul.f32 %v3082_v13, %v1626_v46 }
 0xf2b   :  { %v1530_v9 = vpop.permute.xlu1 %1529 }
 0xf2c   :  { %v1532_v3 = vmul.f32 %v3080_v8, %v1530_v9 }
 0xf2e   :  { %1534 = vrot.lane.b32.xlu1 %v1532_v3, %s3130_s23 }
 0xf33   :  { %v1631_v14 = vpop.permute.xlu0 %1630 }
 0xf34   :  { %v1633_v15 = vmul.f32 %v3082_v13, %v1631_v14 }
 0xf36   :  { %1635 = vrot.lane.b32.xlu0 %v1633_v15, %s3130_s23 }
 0xfa0   :  { %v1535_v17 = vpop.permute.xlu1 %1534 }
 0xfa1   :  { %v3488_v18 = vadd.f32 %v1535_v17, %v1527_v16 }
 0xfa3   :  { %3083 = vtanh.f32 %v3488_v18 }
 0xfa8   :  { %v1636_v20 = vpop.permute.xlu0 %1635 }
 0xfa9   :  { %v3492_v21 = vadd.f32 %v1636_v20, %v1628_v19 }
 0xfab   :  { %3085 = vtanh.f32 %v3492_v21  ;;  %v1900_v59 = vrot.slane %v3492_v21, 4 }
 0xfad   :  { %v3084_v22 = vpop.eup %3083 }
 0xfae   :  { %1540 = vrot.lane.b32.xlu1 %v3084_v22, %s3130_s23 }
 0xfb5   :  { %v3086_v23 = vpop.eup %3085 }
 0xfb6   :  { %1641 = vrot.lane.b32.xlu0 %v3086_v23, %s3130_s23 }
0x1020   :  { %v1541_v24 = vpop.permute.xlu1 %1540 }
0x1021   :  { %v1543_v25 = vmul.f32 %v3080_v8, %v1541_v24 }
0x1023   :  { %1646 = vrot.lane.b32.xlu0 %v1543_v25, %s3131_s4 }
0x1028   :  { %v1642_v26 = vpop.permute.xlu0 %1641 }
0x1029   :  { %v1644_v27 = vmul.f32 %v3082_v13, %v1642_v26 }
0x102b   :  { %v1721_v28 = vrot.slane %v1644_v27, 4 }
0x102d   :  { %1722 = vrot.lane.b32.xlu1 %v1721_v28, %s3131_s4 }
0x1095   :  { %v1647_v29 = vpop.permute.xlu0 %1646 }
0x1096   :  { %2767 = vmatmul.mubr.msk.f32.vlgmr.msra.gmra.mrb[16].mxu1 %vm175_vm2, %v1647_v29 }
0x1097   :  { %2956 = vmatpush3.bf16.msra.mxu1 %v3194_v5  ;;  %2788 = vmatprep.mubr.msk.f32.mxu1 %vm3128_vm1, %v3129_v4 }
0x1098   :  { %2957 = vmatprep.subr.bf16.mxu1 %v3127_v0 }
0x109b   :  { %2959 = vmatpush3.bf16.msra.mxu1 %v3212_v10 }
0x109c   :  { %2966 = vmatprep.subr.bf16.mxu1 %v3127_v0 }
0x109f   :  { %v1723_v30 = vpop.permute.xlu1 %1722 }
0x10a0   :  { %2778 = vmatmul.mubr.msk.f32.vlgmr.msra.gmra.mrb[20].mxu0 %vm175_vm2, %v1723_v30  ;;  %2789 = vmatmul.mubr.msk.f32.vlgmr.msra.gmra.mrb[18].mxu1 %vm175_vm2, %v1723_v30 }
0x10a1   :  { %2968 = vmatpush3.bf16.msra.mxu1 %v3264_v37  ;;  %2962 = vmatpush3.bf16.msra.mxu0 %v3251_v33 }
0x10a2   :  { %2969 = vmatprep.subr.bf16.mxu1 %v3127_v0  ;;  %2963 = vmatprep.subr.bf16.mxu0 %v3127_v0 }
0x10a3   :  { %2810 = vmatprep.mubr.msk.f32.mxu1 %vm3128_vm1, %v3129_v4  ;;  %2799 = vmatprep.mubr.msk.f32.mxu0 %vm3128_vm1, %v3129_v4 }
0x10a5   :  { %2971 = vmatpush3.bf16.msra.mxu1 %v3279_v41  ;;  %2965 = vmatpush3.bf16.msra.mxu0 %v3273_v40 }
0x10a6   :  { %2972 = vmatprep.subr.bf16.mxu0 %v3127_v0  ;;  %2978 = vmatprep.subr.bf16.mxu1 %v3127_v0 }
0x1169   :  { %v1716_v31 = vpop.f32.mrb[16].mxu1 }
0x116a   :  { %v2768_v32 = vpop.f32.mrb[17].mxu1 }
0x1173   :  { %v1792_v35 = vpop.f32.mrb[20].mxu0  ;;  %v1887_v36 = vpop.f32.mrb[18].mxu1 }
0x1174   :  { %v1793_v38 = vadd.f32 %v1792_v35, %v1716_v31  ;;  %v1891_v42 = vadd.f32 %v1887_v36, %v3522_v34  ;;  %v2779_v39 = vpop.f32.mrb[21].mxu0  ;;  %v2790_v43 = vpop.f32.mrb[19].mxu1 }
0x1176   :  { %v1796_v44 = vadd.f32 %v3316_v50, %v1793_v38  ;;  %3087 = vtanh.f32 %v1891_v42  ;;  %v2438_v49 = vmul.f32 -1.442695, %v1891_v42 }
0x1178   :  { %3089 = vtanh.f32 %v1796_v44  ;;  %v2436_v12 = vmul.f32 -1.442695, %v1796_v44 }
0x1179   :  { %3091 = vpow2.f32 %v2438_v49 }
0x117a   :  { %3093 = vpow2.f32 %v2436_v12 }
0x1180   :  { %v3088_v47 = vpop.eup %3087 }
0x1181   :  { %1904 = vrot.lane.b32.xlu1 %v3088_v47, %s3130_s23 }
0x1182   :  { %v3090_v48 = vpop.eup %3089 }
0x1183   :  { %1806 = vrot.lane.b32.xlu0 %v3090_v48, %s3130_s23  ;;  %v3092_v45 = vpop.eup %3091 }
0x1184   :  { %v3094_v51 = vpop.eup %3093  ;;  %v1895_v52 = vadd.f32 1.0, %v3092_v45 }
0x1185   :  { %v1800_v53 = vadd.f32 1.0, %v3094_v51 }
0x1186   :  { %3095 = vrcp.f32 %v1895_v52 }
0x1187   :  { %3097 = vrcp.f32 %v1800_v53 }
0x1190   :  { %v3096_v11 = vpop.eup %3095 }
0x1191   :  { %v3098_v56 = vpop.eup %3097  ;;  %v1902_v60 = vmul.f32 %v3096_v11, %v1900_v59 }
0x1192   :  { %v1804_v63 = vmul.f32 %v3098_v56, %v3488_v18 }
0x11f3   :  { %v1905_v54 = vpop.permute.xlu1 %1904 }
0x11f4   :  { %v1907_v55 = vmul.f32 %v3096_v11, %v1905_v54 }
0x11f5   :  { %v1807_v57 = vpop.permute.xlu0 %1806 }
0x11f6   :  { %v1809_v58 = vmul.f32 %v3098_v56, %v1807_v57  ;;  %1909 = vrot.lane.b32.xlu1 %v1907_v55, %s3130_s23 }
0x11f8   :  { %1811 = vrot.lane.b32.xlu0 %v1809_v58, %s3130_s23 }
0x1268   :  { %v1910_v61 = vpop.permute.xlu1 %1909 }
0x1269   :  { %v3531_v62 = vadd.f32 %v1910_v61, %v1902_v60 }
0x126a   :  { %v1812_v1 = vpop.permute.xlu0 %1811 }
0x126b   :  { %3099 = vtanh.f32 %v3531_v62  ;;  %v3535_v2 = vadd.f32 %v1812_v1, %v1804_v63  ;;  %v2176_v35 = vrot.slane %v3531_v62, 4  ;;  %v2447_v1 = vld [vmem:[%s3597_s7] ss:$0 sm:$0xff] }
0x126d   :  { %3101 = vtanh.f32 %v3535_v2 }
0x1275   :  { %v3100_v6 = vpop.eup %3099 }
0x1276   :  { %1915 = vrot.lane.b32.xlu1 %v3100_v6, %s3130_s23 }
0x1277   :  { %v3102_v7 = vpop.eup %3101 }
0x1278   :  { %1817 = vrot.lane.b32.xlu0 %v3102_v7, %s3130_s23 }
0x12e8   :  { %v1916_v8 = vpop.permute.xlu1 %1915 }
0x12e9   :  { %v1918_v9 = vmul.f32 %v3096_v11, %v1916_v8  ;;  %v14_v8 = vstv %s3598_s8 }
0x12ea   :  { %v1818_v3 = vpop.permute.xlu0 %1817  ;;  %15 = vst [vmem:[#allocation2] sm:$0x1] %v14_v8 }
0x12eb   :  { %v1820_v13 = vmul.f32 %v3098_v56, %v1818_v3  ;;  %1995 = vrot.lane.b32.xlu1 %v1918_v9, %s3131_s4 }
0x12ed   :  { %1920 = vrot.lane.b32.xlu0 %v1820_v13, %s3131_s4 }
0x135d   :  { %v1996_v14 = vpop.permute.xlu1 %1995 }
0x135e   :  { %2811 = vmatmul.mubr.msk.f32.vlgmr.msra.gmra.mrb[20].mxu1 %vm175_vm2, %v1996_v14 }
0x135f   :  { %v1921_v15 = vpop.permute.xlu0 %1920  ;;  %2980 = vmatpush3.bf16.msra.mxu1 %v3251_v33  ;;  %2832 = vmatprep.mubr.msk.f32.mxu1 %vm3128_vm1, %v3129_v4 }
0x1360   :  { %2800 = vmatmul.mubr.msk.f32.vlgmr.msra.gmra.mrb[22].mxu0 %vm175_vm2, %v1921_v15  ;;  %2981 = vmatprep.subr.bf16.mxu1 %v3127_v0 }
0x1361   :  { %2974 = vmatpush3.bf16.msra.mxu0 %v3194_v5  ;;  %2821 = vmatprep.mubr.msk.f32.mxu0 %vm3128_vm1, %v3129_v4 }
0x1362   :  { %2975 = vmatprep.subr.bf16.mxu0 %v3127_v0 }
0x1363   :  { %2983 = vmatpush3.bf16.msra.mxu1 %v3273_v40 }
0x1365   :  { %2977 = vmatpush3.bf16.msra.mxu0 %v3212_v10 }
0x1366   :  { %2984 = vmatprep.subr.bf16.mxu0 %v3127_v0 }
0x1368   :  { %2822 = vmatmul.mubr.msk.f32.vlgmr.msra.gmra.mrb[24].mxu0 %vm175_vm2, %v1996_v14 }
0x1369   :  { %2986 = vmatpush3.bf16.msra.mxu0 %v3264_v37  ;;  %2843 = vmatprep.mubr.msk.f32.mxu0 %vm3128_vm1, %v3129_v4 }
0x136a   :  { %2987 = vmatprep.subr.bf16.mxu0 %v3127_v0 }
0x136d   :  { %2989 = vmatpush3.bf16.msra.mxu0 %v3279_v41 }
0x1431   :  { %v2065_v5 = vpop.f32.mrb[20].mxu1 }
0x1432   :  { %v2812_v33 = vpop.f32.mrb[21].mxu1 }
0x1433   :  { %v1990_v16 = vpop.f32.mrb[22].mxu0  ;;  %v2448_v33 = vld [vmem:[#allocation2] ss:$0 sm:$0xff] }
0x1434   :  { %v2066_v17 = vadd.f32 %v2065_v5, %v1990_v16  ;;  %v2801_v40 = vpop.f32.mrb[23].mxu0 }
0x1436   :  { %v2069_v10 = vadd.f32 %v3316_v50, %v2066_v17 }
0x1438   :  { %3103 = vtanh.f32 %v2069_v10  ;;  %v2441_v4 = vmul.f32 -1.442695, %v2069_v10 }
0x143b   :  { %v2160_v18 = vpop.f32.mrb[24].mxu0 }
0x143c   :  { %v2165_v46 = vrot.slane %v2160_v18, 4  ;;  %v2823_v19 = vpop.f32.mrb[25].mxu0 }
0x143e   :  { %v2167_v37 = vadd.f32 %v2165_v46, %v3522_v34 }
0x1440   :  { %3105 = vtanh.f32 %v2167_v37  ;;  %v2443_v41 = vmul.f32 -1.442695, %v2167_v37 }
0x1441   :  { %3107 = vpow2.f32 %v2441_v4 }
0x1442   :  { %v3104_v20 = vpop.eup %3103  ;;  %3109 = vpow2.f32 %v2443_v41 }
0x1443   :  { %2079 = vrot.lane.b32.xlu1 %v3104_v20, %s3130_s23 }
0x144a   :  { %v3106_v0 = vpop.eup %3105 }
0x144b   :  { %2180 = vrot.lane.b32.xlu0 %v3106_v0, %s3130_s23  ;;  %v3108_v21 = vpop.eup %3107 }
0x144c   :  { %v2073_v22 = vadd.f32 1.0, %v3108_v21  ;;  %v3110_v23 = vpop.eup %3109 }
0x144d   :  { %v2171_v24 = vadd.f32 1.0, %v3110_v23 }
0x144e   :  { %3111 = vrcp.f32 %v2073_v22 }
0x144f   :  { %3113 = vrcp.f32 %v2171_v24 }
0x1458   :  { %v3112_v25 = vpop.eup %3111 }
0x1459   :  { %v3114_v28 = vpop.eup %3113  ;;  %v2077_v31 = vmul.f32 %v3112_v25, %v3535_v2 }
0x145a   :  { %v2178_v36 = vmul.f32 %v3114_v28, %v2176_v35 }
0x14b5   :  { %v2080_v26 = vpop.permute.xlu1 %2079 }
0x14b6   :  { %v2082_v27 = vmul.f32 %v3112_v25, %v2080_v26 }
0x14b8   :  { %2084 = vrot.lane.b32.xlu1 %v2082_v27, %s3130_s23 }
0x14bd   :  { %v2181_v29 = vpop.permute.xlu0 %2180 }
0x14be   :  { %v2183_v30 = vmul.f32 %v3114_v28, %v2181_v29 }
0x14c0   :  { %2185 = vrot.lane.b32.xlu0 %v2183_v30, %s3130_s23 }
0x152a   :  { %v2085_v32 = vpop.permute.xlu1 %2084 }
0x152b   :  { %v2087_v34 = vadd.f32 %v2085_v32, %v2077_v31 }
0x152d   :  { %3115 = vtanh.f32 %v2087_v34 }
0x1532   :  { %v2186_v38 = vpop.permute.xlu0 %2185 }
0x1533   :  { %v2188_v42 = vadd.f32 %v2186_v38, %v2178_v36 }
0x1535   :  { %3117 = vtanh.f32 %v2188_v42 }
0x1537   :  { %v3116_v39 = vpop.eup %3115 }
0x1538   :  { %2090 = vrot.lane.b32.xlu1 %v3116_v39, %s3130_s23 }
0x153f   :  { %v3118_v43 = vpop.eup %3117 }
0x1540   :  { %2191 = vrot.lane.b32.xlu0 %v3118_v43, %s3130_s23 }
0x15aa   :  { %v2091_v44 = vpop.permute.xlu1 %2090 }
0x15ab   :  { %v2093_v47 = vmul.f32 %v3112_v25, %v2091_v44 }
0x15ad   :  { %2196 = vrot.lane.b32.xlu0 %v2093_v47, %s3131_s4 }
0x15b2   :  { %v2192_v48 = vpop.permute.xlu0 %2191 }
0x15b3   :  { %v2194_v49 = vmul.f32 %v3114_v28, %v2192_v48 }
0x15b5   :  { %v2271_v12 = vrot.slane %v2194_v49, 4 }
0x15b7   :  { %2272 = vrot.lane.b32.xlu1 %v2271_v12, %s3131_s4 }
0x161f   :  { %v2197_v45 = vpop.permute.xlu0 %2196 }
0x1620   :  { %2833 = vmatmul.mubr.msk.f32.vlgmr.msra.gmra.mrb[22].mxu1 %vm175_vm2, %v2197_v45 }
0x1629   :  { %v2273_v51 = vpop.permute.xlu1 %2272 }
0x162a   :  { %2844 = vmatmul.mubr.msk.f32.vlgmr.msra.gmra.mrb[26].mxu0 %vm175_vm2, %v2273_v51 }
0x16f3   :  { %v2266_v52 = vpop.f32.mrb[22].mxu1 }
0x16f4   :  { %v2834_v53 = vpop.f32.mrb[23].mxu1 }
0x16fd   :  { %v2342_v11 = vpop.f32.mrb[26].mxu0 }
0x16fe   :  { %v2343_v54 = vadd.f32 %v2342_v11, %v2266_v52  ;;  %v2845_v55 = vpop.f32.mrb[27].mxu0 }
0x1700   :  { %v2346_v56 = vadd.f32 %v3316_v50, %v2343_v54 }
0x1702   :  { %3119 = vtanh.f32 %v2346_v56  ;;  %v2446_v58 = vmul.f32 -1.442695, %v2346_v56 }
0x1704   :  { %3121 = vpow2.f32 %v2446_v58 }
0x170c   :  { %v3120_v57 = vpop.eup %3119 }
0x170d   :  { %2356 = vrot.lane.b32.xlu0 %v3120_v57, %s3130_s23 }
0x170e   :  { %v3122_v59 = vpop.eup %3121 }
0x170f   :  { %v2350_v60 = vadd.f32 1.0, %v3122_v59 }
0x1711   :  { %3123 = vrcp.f32 %v2350_v60 }
0x171b   :  { %v3124_v61 = vpop.eup %3123 }
0x171c   :  { %v2354_v50 = vmul.f32 %v3124_v61, %v2087_v34 }
0x177f   :  { %v2357_v62 = vpop.permute.xlu0 %2356 }
0x1780   :  { %v2359_v63 = vmul.f32 %v3124_v61, %v2357_v62 }
0x1782   :  { %2361 = vrot.lane.b32.xlu1 %v2359_v63, %s3130_s23 }
0x1786   :  { %2377 = vrot.lane.b32.xlu1 %v2447_v1, %s3131_s4 }
0x17f4   :  { %v2362_v2 = vpop.permute.xlu1 %2361 }
0x17f5   :  { %v2364_v6 = vadd.f32 %v2362_v2, %v2354_v50 }
0x17f7   :  { %3125 = vtanh.f32 %v2364_v6 }
0x17f8   :  { %v2378_v3 = vpop.permute.xlu1 %2377 }
0x1801   :  { %v3126_v7 = vpop.eup %3125 }
0x1802   :  { %2367 = vrot.lane.b32.xlu0 %v3126_v7, %s3130_s23 }
0x1874   :  { %v2368_v9 = vpop.permute.xlu0 %2367 }
0x1875   :  { %v2370_v13 = vmul.f32 %v3124_v61, %v2368_v9 }
0x1877   :  { %v2380_v14 = vmul.f32 %v2378_v3, %v2370_v13 }
0x1879   :  { %2382 = vrot.lane.b32.xlu0 %v2380_v14, %s3131_s4 }
0x18eb   :  { %v2383_v15 = vpop.permute.xlu0 %2382 }
0x18ec   :  { %v2386_v5 = vsel %vm2385_vm3, %v2383_v15, 0.0 }
0x18ed   :  { %2387 = vadd.xlane.f32.xlu1 %v2386_v5 }
0x197a   :  { %v2388_v16 = vpop.xlane.xlu1 %2387 }
0x197b   :  { %v2396_v17 = vadd.f32 %v2448_v33, %v2388_v16 }
0x197d   :  { %2398 = vst.msk [vmem:[%s3599_s9] sm:$0xf] %vm2397_vm4, %v2396_v17 }

</bundles_post_ra>
